<compile_context>
chip_gen: v7x
topology: tpu7x:2x2x1
jax: 0.10.0
libtpu: 0.0.40
codegen_flags: <defaults>
</compile_context>

<pallas_src>
import functools
import itertools
from types import SimpleNamespace

import numpy as np
import jax
import jax.numpy as jnp
from jax.experimental import pallas as pl
from jax.experimental.pallas import tpu as pltpu


# ----------------------------------------------------------------------------
# Fused forward kernel (backbone + merge + multi-scale relation module)
# ----------------------------------------------------------------------------

def _trn_forward_kernel(meta, x_ref, bbw_ref, bbb_ref, w1_ref, b1_ref,
                        w2_ref, b2_ref, o_ref):
    """Whole MultiScaleTRN forward in one kernel invocation (no grid).

    x_ref : (B*T, C, H*W) f32     frames, b-major / t-minor rows
    bbw_ref: (C, D) bf16          synthetic backbone projection
    bbb_ref: (1, D) f32
    w1_ref : (sum_s s*D, Hb) bf16 all per-scale first Linear weights, rows
                                  concatenated (static offsets in meta)
    b1_ref : (S, 1, Hb) f32
    w2_ref : (S, Hb, KPAD) bf16   second Linear weights, class dim padded
    b2_ref : (S, 1, KPAD) f32
    o_ref  : (B, KPAD) f32        summed logits (padded class dim)
    """
    B, T, D = meta.B, meta.T, meta.D

    # ---- backbone: GAP over spatial + linear + ReLU, all frames at once ----
    pooled = jnp.mean(x_ref[...], axis=-1)                        # (B*T, C) f32
    feats = jnp.dot(pooled.astype(jnp.bfloat16), bbw_ref[...],
                    preferred_element_type=jnp.float32) + bbb_ref[...]
    feats = jnp.maximum(feats, 0.0)                               # (B*T, D) f32

    # ---- MergeFrame: per-frame (B, D) blocks (rows of feats are b*T + t) ----
    frame_feats = [
        jnp.concatenate(
            [feats[b * T + t: b * T + t + 1, :] for b in range(B)], axis=0)
        for t in range(T)
    ]                                                             # T x (B, D)

    # ---- RelationModuleMultiScale ----
    acc = jnp.zeros((B, meta.KPAD), jnp.float32)
    for scale_id, s in enumerate(meta.scales):
        off = meta.w1_offsets[scale_id]
        w1 = w1_ref[off:off + s * D, :]                           # (s*D, Hb) bf16
        b1 = b1_ref[scale_id]                                     # (1, Hb)   f32
        w2 = w2_ref[scale_id]                                     # (Hb, KPAD) bf16
        b2 = b2_ref[scale_id]                                     # (1, KPAD)  f32

        # Gather + concat the selected relations; batch them along M.
        rels = meta.relations[scale_id]                           # static tuples
        xrel = jnp.concatenate(
            [jnp.concatenate([frame_feats[f] for f in frames], axis=-1)
             for frames in rels],
            axis=0)                                               # (R*B, s*D)

        # NOTE: fc_fusion's leading nn.ReLU() is omitted — backbone features
        #       are already non-negative, so it is a provable no-op.
        h = jnp.dot(xrel.astype(jnp.bfloat16), w1,
                    preferred_element_type=jnp.float32) + b1      # (R*B, Hb)
        h = jnp.maximum(h, 0.0)
        out = jnp.dot(h.astype(jnp.bfloat16), w2,
                      preferred_element_type=jnp.float32) + b2    # (R*B, KPAD)

        # sum over this scale's relations (rows are grouped per relation)
        for r in range(len(rels)):
            acc = acc + out[r * B:(r + 1) * B, :]

    o_ref[...] = acc


# ----------------------------------------------------------------------------
# Module wrapper (parameters, relation bookkeeping, single pallas_call)
# ----------------------------------------------------------------------------

class MultiScaleTRNPallas:
    NUM_BOTTLENECK = 256

    def __init__(self, img_feature_dim, num_frames, num_segs, num_class,
                 in_channels, key):
        self.img_feature_dim = img_feature_dim
        self.num_frames = num_frames
        self.num_class = num_class
        self.kpad = max(128, ((num_class + 127) // 128) * 128)   # lane-dense out

        # Multi-scale relation bookkeeping (RelationModuleMultiScale.__init__).
        # num_segs = number of relations sampled per scale (subsample_num).
        self.scales = list(range(num_frames, 1, -1))
        self.relations_scales = [
            list(itertools.combinations(range(num_frames), s))
            for s in self.scales
        ]
        self.subsample_scales = [
            min(num_segs, len(r)) for r in self.relations_scales
        ]
        rng = np.random.default_rng(0)   # deterministic replacement of np.random.choice
        selected = []
        for i, rels in enumerate(self.relations_scales):
            if i == 0:
                selected.append([0])     # largest scale: only its single relation
            else:
                idx = rng.choice(len(rels), self.subsample_scales[i],
                                 replace=False)
                selected.append([int(j) for j in np.sort(idx)])
        # Static frame-index tuples actually used at forward time.
        self.selected_frame_tuples = tuple(
            tuple(self.relations_scales[i][j] for j in selected[i])
            for i in range(len(self.scales)))

        # ---- deterministic parameter init ----
        D, Hb, K = img_feature_dim, self.NUM_BOTTLENECK, num_class
        n_keys = 2 + 4 * len(self.scales)
        keys = iter(jax.random.split(key, n_keys))

        self.bb_w = (0.05 * jax.random.normal(next(keys), (in_channels, D),
                                              jnp.float32)).astype(jnp.bfloat16)
        self.bb_b = 0.05 * jax.random.normal(next(keys), (1, D), jnp.float32)

        w1_list, b1_list, w2_list, b2_list = [], [], [], []
        self.w1_offsets = []
        off = 0
        for s in self.scales:
            w1 = 0.05 * jax.random.normal(next(keys), (s * D, Hb), jnp.float32)
            b1 = 0.05 * jax.random.normal(next(keys), (1, Hb), jnp.float32)
            w2 = 0.05 * jax.random.normal(next(keys), (Hb, K), jnp.float32)
            b2 = 0.05 * jax.random.normal(next(keys), (1, K), jnp.float32)
            self.w1_offsets.append(off)
            off += s * D
            w1_list.append(w1)
            b1_list.append(b1)
            # zero-pad the class dim to KPAD lanes (sliced back outside kernel)
            w2_list.append(jnp.pad(w2, ((0, 0), (0, self.kpad - K))))
            b2_list.append(jnp.pad(b2, ((0, 0), (0, self.kpad - K))))

        self.w1_cat = jnp.concatenate(w1_list, axis=0).astype(jnp.bfloat16)
        self.b1_stack = jnp.stack(b1_list, axis=0)                       # (S,1,Hb)
        self.w2_stack = jnp.stack(w2_list, axis=0).astype(jnp.bfloat16)  # (S,Hb,KPAD)
        self.b2_stack = jnp.stack(b2_list, axis=0)                       # (S,1,KPAD)

    def __call__(self, x):
        """x: (B, T, C, H, W) float32 -> (B, num_class) float32."""
        B, T, C, H, W = x.shape
        assert T == self.num_frames
        D = self.img_feature_dim

        # Free reshape (contiguous merge, no transpose / no extra HBM traffic).
        x4 = x.reshape(B * T, C, H * W)

        meta = SimpleNamespace(
            B=B, T=T, D=D, Hb=self.NUM_BOTTLENECK, KPAD=self.kpad,
            scales=tuple(self.scales),
            w1_offsets=tuple(self.w1_offsets),
            relations=self.selected_frame_tuples)

        vmem_spec = pl.BlockSpec(memory_space=pltpu.MemorySpace.VMEM)
        out_pad = pl.pallas_call(
            functools.partial(_trn_forward_kernel, meta),
            out_shape=jax.ShapeDtypeStruct((B, self.kpad), jnp.float32),
            in_specs=[vmem_spec] * 7,
            out_specs=vmem_spec,
        )(x4, self.bb_w, self.bb_b, self.w1_cat, self.b1_stack,
          self.w2_stack, self.b2_stack)

        return out_pad[:, :self.num_class]


# ----------------------------------------------------------------------------
# Demo
# ----------------------------------------------------------------------------

if __name__ == "__main__":
    # Small, module-consistent shapes.
    B, T, C, H, W = 2, 8, 4, 16, 16
    img_feature_dim = 32
    num_frames = T
    num_segs = 3
    num_class = 16

    key = jax.random.PRNGKey(0)
    k_x, k_params = jax.random.split(key)

    x = jax.random.normal(k_x, (B, T, C, H, W), jnp.float32)

    model = MultiScaleTRNPallas(img_feature_dim, num_frames, num_segs,
                                num_class, in_channels=C, key=k_params)

    out = model(x)
    out = jax.block_until_ready(out)
    assert out.shape == (B, num_class), out.shape
    assert out.dtype == jnp.float32
    assert bool(jnp.all(jnp.isfinite(out)))
    print("KERNEL_OK")
</pallas_src>

<mosaic_0001>
module attributes {stable_mosaic.version = 11 : i64} {
  func.func @_trn_forward_kernel(%arg0: memref<16x4x256xf32, #tpu.memory_space<vmem>>, %arg1: memref<4x32xbf16, #tpu.memory_space<vmem>>, %arg2: memref<1x32xf32, #tpu.memory_space<vmem>>, %arg3: memref<1120x256xbf16, #tpu.memory_space<vmem>>, %arg4: memref<7x1x256xf32, #tpu.memory_space<vmem>>, %arg5: memref<7x256x128xbf16, #tpu.memory_space<vmem>>, %arg6: memref<7x1x128xf32, #tpu.memory_space<vmem>>, %arg7: memref<2x128xf32, #tpu.memory_space<vmem>>) attributes {dimension_semantics = [], scalar_prefetch = 0 : i64, scratch_operands = 0 : i64, tpu.core_type = #tpu.core_type<tc>} {
    %c0 = arith.constant 0 : index
    %c0_0 = arith.constant 0 : index
    %c0_1 = arith.constant 0 : index
    %0 = vector.load %arg0[%c0, %c0_0, %c0_1] : memref<16x4x256xf32, #tpu.memory_space<vmem>>, vector<16x4x256xf32>
    %cst = arith.constant dense<0.000000e+00> : vector<16x4xf32>
    %1 = vector.multi_reduction <add>, %0, %cst [2] : vector<16x4x256xf32> to vector<16x4xf32>
    %cst_2 = arith.constant 2.560000e+02 : f32
    %2 = vector.broadcast %cst_2 : f32 to vector<16x4xf32>
    %3 = arith.divf %1, %2 : vector<16x4xf32>
    %4 = arith.truncf %3 : vector<16x4xf32> to vector<16x4xbf16>
    %c0_3 = arith.constant 0 : index
    %c0_4 = arith.constant 0 : index
    %5 = vector.load %arg1[%c0_3, %c0_4] : memref<4x32xbf16, #tpu.memory_space<vmem>>, vector<4x32xbf16>
    %cst_5 = arith.constant dense<0.000000e+00> : vector<16x32xf32>
    %6 = tpu.matmul %4, %5, %cst_5 {dimension_numbers = #tpu.dot_dimension_numbers<[1], [0], [0], [1], [0, 0, 1, 1], [], []>} : vector<16x4xbf16>, vector<4x32xbf16>, vector<16x32xf32> -> vector<16x32xf32>
    %c0_6 = arith.constant 0 : index
    %c0_7 = arith.constant 0 : index
    %7 = vector.load %arg2[%c0_6, %c0_7] : memref<1x32xf32, #tpu.memory_space<vmem>>, vector<1x32xf32>
    %8 = vector.broadcast %7 : vector<1x32xf32> to vector<16x32xf32>
    %9 = arith.addf %6, %8 : vector<16x32xf32>
    %cst_8 = arith.constant 0.000000e+00 : f32
    %10 = vector.broadcast %cst_8 : f32 to vector<16x32xf32>
    %11 = arith.maximumf %9, %10 : vector<16x32xf32>
    %12 = vector.extract_strided_slice %11 {offsets = [0, 0], sizes = [1, 32], strides = [1, 1]} : vector<16x32xf32> to vector<1x32xf32>
    %13 = vector.extract_strided_slice %11 {offsets = [8, 0], sizes = [1, 32], strides = [1, 1]} : vector<16x32xf32> to vector<1x32xf32>
    %14 = tpu.concatenate %12, %13 in 0 : vector<1x32xf32>, vector<1x32xf32> -> vector<2x32xf32>
    %15 = vector.extract_strided_slice %11 {offsets = [1, 0], sizes = [1, 32], strides = [1, 1]} : vector<16x32xf32> to vector<1x32xf32>
    %16 = vector.extract_strided_slice %11 {offsets = [9, 0], sizes = [1, 32], strides = [1, 1]} : vector<16x32xf32> to vector<1x32xf32>
    %17 = tpu.concatenate %15, %16 in 0 : vector<1x32xf32>, vector<1x32xf32> -> vector<2x32xf32>
    %18 = vector.extract_strided_slice %11 {offsets = [2, 0], sizes = [1, 32], strides = [1, 1]} : vector<16x32xf32> to vector<1x32xf32>
    %19 = vector.extract_strided_slice %11 {offsets = [10, 0], sizes = [1, 32], strides = [1, 1]} : vector<16x32xf32> to vector<1x32xf32>
    %20 = tpu.concatenate %18, %19 in 0 : vector<1x32xf32>, vector<1x32xf32> -> vector<2x32xf32>
    %21 = vector.extract_strided_slice %11 {offsets = [3, 0], sizes = [1, 32], strides = [1, 1]} : vector<16x32xf32> to vector<1x32xf32>
    %22 = vector.extract_strided_slice %11 {offsets = [11, 0], sizes = [1, 32], strides = [1, 1]} : vector<16x32xf32> to vector<1x32xf32>
    %23 = tpu.concatenate %21, %22 in 0 : vector<1x32xf32>, vector<1x32xf32> -> vector<2x32xf32>
    %24 = vector.extract_strided_slice %11 {offsets = [4, 0], sizes = [1, 32], strides = [1, 1]} : vector<16x32xf32> to vector<1x32xf32>
    %25 = vector.extract_strided_slice %11 {offsets = [12, 0], sizes = [1, 32], strides = [1, 1]} : vector<16x32xf32> to vector<1x32xf32>
    %26 = tpu.concatenate %24, %25 in 0 : vector<1x32xf32>, vector<1x32xf32> -> vector<2x32xf32>
    %27 = vector.extract_strided_slice %11 {offsets = [5, 0], sizes = [1, 32], strides = [1, 1]} : vector<16x32xf32> to vector<1x32xf32>
    %28 = vector.extract_strided_slice %11 {offsets = [13, 0], sizes = [1, 32], strides = [1, 1]} : vector<16x32xf32> to vector<1x32xf32>
    %29 = tpu.concatenate %27, %28 in 0 : vector<1x32xf32>, vector<1x32xf32> -> vector<2x32xf32>
    %30 = vector.extract_strided_slice %11 {offsets = [6, 0], sizes = [1, 32], strides = [1, 1]} : vector<16x32xf32> to vector<1x32xf32>
    %31 = vector.extract_strided_slice %11 {offsets = [14, 0], sizes = [1, 32], strides = [1, 1]} : vector<16x32xf32> to vector<1x32xf32>
    %32 = tpu.concatenate %30, %31 in 0 : vector<1x32xf32>, vector<1x32xf32> -> vector<2x32xf32>
    %33 = vector.extract_strided_slice %11 {offsets = [7, 0], sizes = [1, 32], strides = [1, 1]} : vector<16x32xf32> to vector<1x32xf32>
    %34 = vector.extract_strided_slice %11 {offsets = [15, 0], sizes = [1, 32], strides = [1, 1]} : vector<16x32xf32> to vector<1x32xf32>
    %35 = tpu.concatenate %33, %34 in 0 : vector<1x32xf32>, vector<1x32xf32> -> vector<2x32xf32>
    %cst_9 = arith.constant 0.000000e+00 : f32
    %36 = vector.broadcast %cst_9 : f32 to vector<2x128xf32>
    %c0_10 = arith.constant 0 : index
    %c0_11 = arith.constant 0 : index
    %37 = vector.load %arg3[%c0_10, %c0_11] : memref<1120x256xbf16, #tpu.memory_space<vmem>>, vector<256x256xbf16>
    %c0_12 = arith.constant 0 : index
    %c0_13 = arith.constant 0 : index
    %c0_14 = arith.constant 0 : index
    %38 = vector.load %arg4[%c0_12, %c0_13, %c0_14] : memref<7x1x256xf32, #tpu.memory_space<vmem>>, vector<1x1x256xf32>
    %39 = vector.shape_cast %38 : vector<1x1x256xf32> to vector<1x256xf32>
    %c0_15 = arith.constant 0 : index
    %c0_16 = arith.constant 0 : index
    %c0_17 = arith.constant 0 : index
    %40 = vector.load %arg5[%c0_15, %c0_16, %c0_17] : memref<7x256x128xbf16, #tpu.memory_space<vmem>>, vector<1x256x128xbf16>
    %41 = vector.shape_cast %40 : vector<1x256x128xbf16> to vector<256x128xbf16>
    %c0_18 = arith.constant 0 : index
    %c0_19 = arith.constant 0 : index
    %c0_20 = arith.constant 0 : index
    %42 = vector.load %arg6[%c0_18, %c0_19, %c0_20] : memref<7x1x128xf32, #tpu.memory_space<vmem>>, vector<1x1x128xf32>
    %43 = vector.shape_cast %42 : vector<1x1x128xf32> to vector<1x128xf32>
    %44 = tpu.concatenate %14, %17, %20, %23, %26, %29, %32, %35 in 1 : vector<2x32xf32>, vector<2x32xf32>, vector<2x32xf32>, vector<2x32xf32>, vector<2x32xf32>, vector<2x32xf32>, vector<2x32xf32>, vector<2x32xf32> -> vector<2x256xf32>
    %45 = arith.truncf %44 : vector<2x256xf32> to vector<2x256xbf16>
    %cst_21 = arith.constant dense<0.000000e+00> : vector<2x256xf32>
    %46 = tpu.matmul %45, %37, %cst_21 {dimension_numbers = #tpu.dot_dimension_numbers<[1], [0], [0], [1], [0, 0, 1, 1], [], []>} : vector<2x256xbf16>, vector<256x256xbf16>, vector<2x256xf32> -> vector<2x256xf32>
    %47 = vector.broadcast %39 : vector<1x256xf32> to vector<2x256xf32>
    %48 = arith.addf %46, %47 : vector<2x256xf32>
    %cst_22 = arith.constant 0.000000e+00 : f32
    %49 = vector.broadcast %cst_22 : f32 to vector<2x256xf32>
    %50 = arith.maximumf %48, %49 : vector<2x256xf32>
    %51 = arith.truncf %50 : vector<2x256xf32> to vector<2x256xbf16>
    %cst_23 = arith.constant dense<0.000000e+00> : vector<2x128xf32>
    %52 = tpu.matmul %51, %41, %cst_23 {dimension_numbers = #tpu.dot_dimension_numbers<[1], [0], [0], [1], [0, 0, 1, 1], [], []>} : vector<2x256xbf16>, vector<256x128xbf16>, vector<2x128xf32> -> vector<2x128xf32>
    %53 = vector.broadcast %43 : vector<1x128xf32> to vector<2x128xf32>
    %54 = arith.addf %52, %53 : vector<2x128xf32>
    %55 = arith.addf %36, %54 : vector<2x128xf32>
    %c256 = arith.constant 256 : index
    %c0_24 = arith.constant 0 : index
    %56 = vector.load %arg3[%c256, %c0_24] : memref<1120x256xbf16, #tpu.memory_space<vmem>>, vector<224x256xbf16>
    %c1 = arith.constant 1 : index
    %c0_25 = arith.constant 0 : index
    %c0_26 = arith.constant 0 : index
    %57 = vector.load %arg4[%c1, %c0_25, %c0_26] : memref<7x1x256xf32, #tpu.memory_space<vmem>>, vector<1x1x256xf32>
    %58 = vector.shape_cast %57 : vector<1x1x256xf32> to vector<1x256xf32>
    %c1_27 = arith.constant 1 : index
    %c0_28 = arith.constant 0 : index
    %c0_29 = arith.constant 0 : index
    %59 = vector.load %arg5[%c1_27, %c0_28, %c0_29] : memref<7x256x128xbf16, #tpu.memory_space<vmem>>, vector<1x256x128xbf16>
    %60 = vector.shape_cast %59 : vector<1x256x128xbf16> to vector<256x128xbf16>
    %c1_30 = arith.constant 1 : index
    %c0_31 = arith.constant 0 : index
    %c0_32 = arith.constant 0 : index
    %61 = vector.load %arg6[%c1_30, %c0_31, %c0_32] : memref<7x1x128xf32, #tpu.memory_space<vmem>>, vector<1x1x128xf32>
    %62 = vector.shape_cast %61 : vector<1x1x128xf32> to vector<1x128xf32>
    %63 = tpu.concatenate %14, %17, %20, %26, %29, %32, %35 in 1 : vector<2x32xf32>, vector<2x32xf32>, vector<2x32xf32>, vector<2x32xf32>, vector<2x32xf32>, vector<2x32xf32>, vector<2x32xf32> -> vector<2x224xf32>
    %64 = tpu.concatenate %14, %17, %23, %26, %29, %32, %35 in 1 : vector<2x32xf32>, vector<2x32xf32>, vector<2x32xf32>, vector<2x32xf32>, vector<2x32xf32>, vector<2x32xf32>, vector<2x32xf32> -> vector<2x224xf32>
    %65 = tpu.concatenate %17, %20, %23, %26, %29, %32, %35 in 1 : vector<2x32xf32>, vector<2x32xf32>, vector<2x32xf32>, vector<2x32xf32>, vector<2x32xf32>, vector<2x32xf32>, vector<2x32xf32> -> vector<2x224xf32>
    %66 = tpu.concatenate %63, %64, %65 in 0 : vector<2x224xf32>, vector<2x224xf32>, vector<2x224xf32> -> vector<6x224xf32>
    %67 = arith.truncf %66 : vector<6x224xf32> to vector<6x224xbf16>
    %cst_33 = arith.constant dense<0.000000e+00> : vector<6x256xf32>
    %68 = tpu.matmul %67, %56, %cst_33 {dimension_numbers = #tpu.dot_dimension_numbers<[1], [0], [0], [1], [0, 0, 1, 1], [], []>} : vector<6x224xbf16>, vector<224x256xbf16>, vector<6x256xf32> -> vector<6x256xf32>
    %69 = vector.broadcast %58 : vector<1x256xf32> to vector<6x256xf32>
    %70 = arith.addf %68, %69 : vector<6x256xf32>
    %cst_34 = arith.constant 0.000000e+00 : f32
    %71 = vector.broadcast %cst_34 : f32 to vector<6x256xf32>
    %72 = arith.maximumf %70, %71 : vector<6x256xf32>
    %73 = arith.truncf %72 : vector<6x256xf32> to vector<6x256xbf16>
    %cst_35 = arith.constant dense<0.000000e+00> : vector<6x128xf32>
    %74 = tpu.matmul %73, %60, %cst_35 {dimension_numbers = #tpu.dot_dimension_numbers<[1], [0], [0], [1], [0, 0, 1, 1], [], []>} : vector<6x256xbf16>, vector<256x128xbf16>, vector<6x128xf32> -> vector<6x128xf32>
    %75 = vector.broadcast %62 : vector<1x128xf32> to vector<6x128xf32>
    %76 = arith.addf %74, %75 : vector<6x128xf32>
    %77 = vector.extract_strided_slice %76 {offsets = [0, 0], sizes = [2, 128], strides = [1, 1]} : vector<6x128xf32> to vector<2x128xf32>
    %78 = arith.addf %55, %77 : vector<2x128xf32>
    %79 = vector.extract_strided_slice %76 {offsets = [2, 0], sizes = [2, 128], strides = [1, 1]} : vector<6x128xf32> to vector<2x128xf32>
    %80 = arith.addf %78, %79 : vector<2x128xf32>
    %81 = vector.extract_strided_slice %76 {offsets = [4, 0], sizes = [2, 128], strides = [1, 1]} : vector<6x128xf32> to vector<2x128xf32>
    %82 = arith.addf %80, %81 : vector<2x128xf32>
    %c480 = arith.constant 480 : index
    %c0_36 = arith.constant 0 : index
    %83 = vector.load %arg3[%c480, %c0_36] : memref<1120x256xbf16, #tpu.memory_space<vmem>>, vector<192x256xbf16>
    %c2 = arith.constant 2 : index
    %c0_37 = arith.constant 0 : index
    %c0_38 = arith.constant 0 : index
    %84 = vector.load %arg4[%c2, %c0_37, %c0_38] : memref<7x1x256xf32, #tpu.memory_space<vmem>>, vector<1x1x256xf32>
    %85 = vector.shape_cast %84 : vector<1x1x256xf32> to vector<1x256xf32>
    %c2_39 = arith.constant 2 : index
    %c0_40 = arith.constant 0 : index
    %c0_41 = arith.constant 0 : index
    %86 = vector.load %arg5[%c2_39, %c0_40, %c0_41] : memref<7x256x128xbf16, #tpu.memory_space<vmem>>, vector<1x256x128xbf16>
    %87 = vector.shape_cast %86 : vector<1x256x128xbf16> to vector<256x128xbf16>
    %c2_42 = arith.constant 2 : index
    %c0_43 = arith.constant 0 : index
    %c0_44 = arith.constant 0 : index
    %88 = vector.load %arg6[%c2_42, %c0_43, %c0_44] : memref<7x1x128xf32, #tpu.memory_space<vmem>>, vector<1x1x128xf32>
    %89 = vector.shape_cast %88 : vector<1x1x128xf32> to vector<1x128xf32>
    %90 = tpu.concatenate %14, %17, %20, %23, %26, %29 in 1 : vector<2x32xf32>, vector<2x32xf32>, vector<2x32xf32>, vector<2x32xf32>, vector<2x32xf32>, vector<2x32xf32> -> vector<2x192xf32>
    %91 = tpu.concatenate %14, %17, %20, %23, %26, %32 in 1 : vector<2x32xf32>, vector<2x32xf32>, vector<2x32xf32>, vector<2x32xf32>, vector<2x32xf32>, vector<2x32xf32> -> vector<2x192xf32>
    %92 = tpu.concatenate %14, %17, %20, %23, %26, %35 in 1 : vector<2x32xf32>, vector<2x32xf32>, vector<2x32xf32>, vector<2x32xf32>, vector<2x32xf32>, vector<2x32xf32> -> vector<2x192xf32>
    %93 = tpu.concatenate %90, %91, %92 in 0 : vector<2x192xf32>, vector<2x192xf32>, vector<2x192xf32> -> vector<6x192xf32>
    %94 = arith.truncf %93 : vector<6x192xf32> to vector<6x192xbf16>
    %cst_45 = arith.constant dense<0.000000e+00> : vector<6x256xf32>
    %95 = tpu.matmul %94, %83, %cst_45 {dimension_numbers = #tpu.dot_dimension_numbers<[1], [0], [0], [1], [0, 0, 1, 1], [], []>} : vector<6x192xbf16>, vector<192x256xbf16>, vector<6x256xf32> -> vector<6x256xf32>
    %96 = vector.broadcast %85 : vector<1x256xf32> to vector<6x256xf32>
    %97 = arith.addf %95, %96 : vector<6x256xf32>
    %cst_46 = arith.constant 0.000000e+00 : f32
    %98 = vector.broadcast %cst_46 : f32 to vector<6x256xf32>
    %99 = arith.maximumf %97, %98 : vector<6x256xf32>
    %100 = arith.truncf %99 : vector<6x256xf32> to vector<6x256xbf16>
    %cst_47 = arith.constant dense<0.000000e+00> : vector<6x128xf32>
    %101 = tpu.matmul %100, %87, %cst_47 {dimension_numbers = #tpu.dot_dimension_numbers<[1], [0], [0], [1], [0, 0, 1, 1], [], []>} : vector<6x256xbf16>, vector<256x128xbf16>, vector<6x128xf32> -> vector<6x128xf32>
    %102 = vector.broadcast %89 : vector<1x128xf32> to vector<6x128xf32>
    %103 = arith.addf %101, %102 : vector<6x128xf32>
    %104 = vector.extract_strided_slice %103 {offsets = [0, 0], sizes = [2, 128], strides = [1, 1]} : vector<6x128xf32> to vector<2x128xf32>
    %105 = arith.addf %82, %104 : vector<2x128xf32>
    %106 = vector.extract_strided_slice %103 {offsets = [2, 0], sizes = [2, 128], strides = [1, 1]} : vector<6x128xf32> to vector<2x128xf32>
    %107 = arith.addf %105, %106 : vector<2x128xf32>
    %108 = vector.extract_strided_slice %103 {offsets = [4, 0], sizes = [2, 128], strides = [1, 1]} : vector<6x128xf32> to vector<2x128xf32>
    %109 = arith.addf %107, %108 : vector<2x128xf32>
    %c672 = arith.constant 672 : index
    %c0_48 = arith.constant 0 : index
    %110 = vector.load %arg3[%c672, %c0_48] : memref<1120x256xbf16, #tpu.memory_space<vmem>>, vector<160x256xbf16>
    %c3 = arith.constant 3 : index
    %c0_49 = arith.constant 0 : index
    %c0_50 = arith.constant 0 : index
    %111 = vector.load %arg4[%c3, %c0_49, %c0_50] : memref<7x1x256xf32, #tpu.memory_space<vmem>>, vector<1x1x256xf32>
    %112 = vector.shape_cast %111 : vector<1x1x256xf32> to vector<1x256xf32>
    %c3_51 = arith.constant 3 : index
    %c0_52 = arith.constant 0 : index
    %c0_53 = arith.constant 0 : index
    %113 = vector.load %arg5[%c3_51, %c0_52, %c0_53] : memref<7x256x128xbf16, #tpu.memory_space<vmem>>, vector<1x256x128xbf16>
    %114 = vector.shape_cast %113 : vector<1x256x128xbf16> to vector<256x128xbf16>
    %c3_54 = arith.constant 3 : index
    %c0_55 = arith.constant 0 : index
    %c0_56 = arith.constant 0 : index
    %115 = vector.load %arg6[%c3_54, %c0_55, %c0_56] : memref<7x1x128xf32, #tpu.memory_space<vmem>>, vector<1x1x128xf32>
    %116 = vector.shape_cast %115 : vector<1x1x128xf32> to vector<1x128xf32>
    %117 = tpu.concatenate %14, %20, %26, %32, %35 in 1 : vector<2x32xf32>, vector<2x32xf32>, vector<2x32xf32>, vector<2x32xf32>, vector<2x32xf32> -> vector<2x160xf32>
    %118 = tpu.concatenate %17, %20, %23, %26, %29 in 1 : vector<2x32xf32>, vector<2x32xf32>, vector<2x32xf32>, vector<2x32xf32>, vector<2x32xf32> -> vector<2x160xf32>
    %119 = tpu.concatenate %20, %23, %26, %29, %32 in 1 : vector<2x32xf32>, vector<2x32xf32>, vector<2x32xf32>, vector<2x32xf32>, vector<2x32xf32> -> vector<2x160xf32>
    %120 = tpu.concatenate %117, %118, %119 in 0 : vector<2x160xf32>, vector<2x160xf32>, vector<2x160xf32> -> vector<6x160xf32>
    %121 = arith.truncf %120 : vector<6x160xf32> to vector<6x160xbf16>
    %cst_57 = arith.constant dense<0.000000e+00> : vector<6x256xf32>
    %122 = tpu.matmul %121, %110, %cst_57 {dimension_numbers = #tpu.dot_dimension_numbers<[1], [0], [0], [1], [0, 0, 1, 1], [], []>} : vector<6x160xbf16>, vector<160x256xbf16>, vector<6x256xf32> -> vector<6x256xf32>
    %123 = vector.broadcast %112 : vector<1x256xf32> to vector<6x256xf32>
    %124 = arith.addf %122, %123 : vector<6x256xf32>
    %cst_58 = arith.constant 0.000000e+00 : f32
    %125 = vector.broadcast %cst_58 : f32 to vector<6x256xf32>
    %126 = arith.maximumf %124, %125 : vector<6x256xf32>
    %127 = arith.truncf %126 : vector<6x256xf32> to vector<6x256xbf16>
    %cst_59 = arith.constant dense<0.000000e+00> : vector<6x128xf32>
    %128 = tpu.matmul %127, %114, %cst_59 {dimension_numbers = #tpu.dot_dimension_numbers<[1], [0], [0], [1], [0, 0, 1, 1], [], []>} : vector<6x256xbf16>, vector<256x128xbf16>, vector<6x128xf32> -> vector<6x128xf32>
    %129 = vector.broadcast %116 : vector<1x128xf32> to vector<6x128xf32>
    %130 = arith.addf %128, %129 : vector<6x128xf32>
    %131 = vector.extract_strided_slice %130 {offsets = [0, 0], sizes = [2, 128], strides = [1, 1]} : vector<6x128xf32> to vector<2x128xf32>
    %132 = arith.addf %109, %131 : vector<2x128xf32>
    %133 = vector.extract_strided_slice %130 {offsets = [2, 0], sizes = [2, 128], strides = [1, 1]} : vector<6x128xf32> to vector<2x128xf32>
    %134 = arith.addf %132, %133 : vector<2x128xf32>
    %135 = vector.extract_strided_slice %130 {offsets = [4, 0], sizes = [2, 128], strides = [1, 1]} : vector<6x128xf32> to vector<2x128xf32>
    %136 = arith.addf %134, %135 : vector<2x128xf32>
    %c832 = arith.constant 832 : index
    %c0_60 = arith.constant 0 : index
    %137 = vector.load %arg3[%c832, %c0_60] : memref<1120x256xbf16, #tpu.memory_space<vmem>>, vector<128x256xbf16>
    %c4 = arith.constant 4 : index
    %c0_61 = arith.constant 0 : index
    %c0_62 = arith.constant 0 : index
    %138 = vector.load %arg4[%c4, %c0_61, %c0_62] : memref<7x1x256xf32, #tpu.memory_space<vmem>>, vector<1x1x256xf32>
    %139 = vector.shape_cast %138 : vector<1x1x256xf32> to vector<1x256xf32>
    %c4_63 = arith.constant 4 : index
    %c0_64 = arith.constant 0 : index
    %c0_65 = arith.constant 0 : index
    %140 = vector.load %arg5[%c4_63, %c0_64, %c0_65] : memref<7x256x128xbf16, #tpu.memory_space<vmem>>, vector<1x256x128xbf16>
    %141 = vector.shape_cast %140 : vector<1x256x128xbf16> to vector<256x128xbf16>
    %c4_66 = arith.constant 4 : index
    %c0_67 = arith.constant 0 : index
    %c0_68 = arith.constant 0 : index
    %142 = vector.load %arg6[%c4_66, %c0_67, %c0_68] : memref<7x1x128xf32, #tpu.memory_space<vmem>>, vector<1x1x128xf32>
    %143 = vector.shape_cast %142 : vector<1x1x128xf32> to vector<1x128xf32>
    %144 = tpu.concatenate %17, %20, %23, %35 in 1 : vector<2x32xf32>, vector<2x32xf32>, vector<2x32xf32>, vector<2x32xf32> -> vector<2x128xf32>
    %145 = tpu.concatenate %17, %20, %29, %35 in 1 : vector<2x32xf32>, vector<2x32xf32>, vector<2x32xf32>, vector<2x32xf32> -> vector<2x128xf32>
    %146 = tpu.concatenate %17, %23, %29, %35 in 1 : vector<2x32xf32>, vector<2x32xf32>, vector<2x32xf32>, vector<2x32xf32> -> vector<2x128xf32>
    %147 = tpu.concatenate %144, %145, %146 in 0 : vector<2x128xf32>, vector<2x128xf32>, vector<2x128xf32> -> vector<6x128xf32>
    %148 = arith.truncf %147 : vector<6x128xf32> to vector<6x128xbf16>
    %cst_69 = arith.constant dense<0.000000e+00> : vector<6x256xf32>
    %149 = tpu.matmul %148, %137, %cst_69 {dimension_numbers = #tpu.dot_dimension_numbers<[1], [0], [0], [1], [0, 0, 1, 1], [], []>} : vector<6x128xbf16>, vector<128x256xbf16>, vector<6x256xf32> -> vector<6x256xf32>
    %150 = vector.broadcast %139 : vector<1x256xf32> to vector<6x256xf32>
    %151 = arith.addf %149, %150 : vector<6x256xf32>
    %cst_70 = arith.constant 0.000000e+00 : f32
    %152 = vector.broadcast %cst_70 : f32 to vector<6x256xf32>
    %153 = arith.maximumf %151, %152 : vector<6x256xf32>
    %154 = arith.truncf %153 : vector<6x256xf32> to vector<6x256xbf16>
    %cst_71 = arith.constant dense<0.000000e+00> : vector<6x128xf32>
    %155 = tpu.matmul %154, %141, %cst_71 {dimension_numbers = #tpu.dot_dimension_numbers<[1], [0], [0], [1], [0, 0, 1, 1], [], []>} : vector<6x256xbf16>, vector<256x128xbf16>, vector<6x128xf32> -> vector<6x128xf32>
    %156 = vector.broadcast %143 : vector<1x128xf32> to vector<6x128xf32>
    %157 = arith.addf %155, %156 : vector<6x128xf32>
    %158 = vector.extract_strided_slice %157 {offsets = [0, 0], sizes = [2, 128], strides = [1, 1]} : vector<6x128xf32> to vector<2x128xf32>
    %159 = arith.addf %136, %158 : vector<2x128xf32>
    %160 = vector.extract_strided_slice %157 {offsets = [2, 0], sizes = [2, 128], strides = [1, 1]} : vector<6x128xf32> to vector<2x128xf32>
    %161 = arith.addf %159, %160 : vector<2x128xf32>
    %162 = vector.extract_strided_slice %157 {offsets = [4, 0], sizes = [2, 128], strides = [1, 1]} : vector<6x128xf32> to vector<2x128xf32>
    %163 = arith.addf %161, %162 : vector<2x128xf32>
    %c960 = arith.constant 960 : index
    %c0_72 = arith.constant 0 : index
    %164 = vector.load %arg3[%c960, %c0_72] : memref<1120x256xbf16, #tpu.memory_space<vmem>>, vector<96x256xbf16>
    %c5 = arith.constant 5 : index
    %c0_73 = arith.constant 0 : index
    %c0_74 = arith.constant 0 : index
    %165 = vector.load %arg4[%c5, %c0_73, %c0_74] : memref<7x1x256xf32, #tpu.memory_space<vmem>>, vector<1x1x256xf32>
    %166 = vector.shape_cast %165 : vector<1x1x256xf32> to vector<1x256xf32>
    %c5_75 = arith.constant 5 : index
    %c0_76 = arith.constant 0 : index
    %c0_77 = arith.constant 0 : index
    %167 = vector.load %arg5[%c5_75, %c0_76, %c0_77] : memref<7x256x128xbf16, #tpu.memory_space<vmem>>, vector<1x256x128xbf16>
    %168 = vector.shape_cast %167 : vector<1x256x128xbf16> to vector<256x128xbf16>
    %c5_78 = arith.constant 5 : index
    %c0_79 = arith.constant 0 : index
    %c0_80 = arith.constant 0 : index
    %169 = vector.load %arg6[%c5_78, %c0_79, %c0_80] : memref<7x1x128xf32, #tpu.memory_space<vmem>>, vector<1x1x128xf32>
    %170 = vector.shape_cast %169 : vector<1x1x128xf32> to vector<1x128xf32>
    %171 = tpu.concatenate %14, %23, %35 in 1 : vector<2x32xf32>, vector<2x32xf32>, vector<2x32xf32> -> vector<2x96xf32>
    %172 = tpu.concatenate %20, %23, %29 in 1 : vector<2x32xf32>, vector<2x32xf32>, vector<2x32xf32> -> vector<2x96xf32>
    %173 = tpu.concatenate %20, %29, %35 in 1 : vector<2x32xf32>, vector<2x32xf32>, vector<2x32xf32> -> vector<2x96xf32>
    %174 = tpu.concatenate %171, %172, %173 in 0 : vector<2x96xf32>, vector<2x96xf32>, vector<2x96xf32> -> vector<6x96xf32>
    %175 = arith.truncf %174 : vector<6x96xf32> to vector<6x96xbf16>
    %cst_81 = arith.constant dense<0.000000e+00> : vector<6x256xf32>
    %176 = tpu.matmul %175, %164, %cst_81 {dimension_numbers = #tpu.dot_dimension_numbers<[1], [0], [0], [1], [0, 0, 1, 1], [], []>} : vector<6x96xbf16>, vector<96x256xbf16>, vector<6x256xf32> -> vector<6x256xf32>
    %177 = vector.broadcast %166 : vector<1x256xf32> to vector<6x256xf32>
    %178 = arith.addf %176, %177 : vector<6x256xf32>
    %cst_82 = arith.constant 0.000000e+00 : f32
    %179 = vector.broadcast %cst_82 : f32 to vector<6x256xf32>
    %180 = arith.maximumf %178, %179 : vector<6x256xf32>
    %181 = arith.truncf %180 : vector<6x256xf32> to vector<6x256xbf16>
    %cst_83 = arith.constant dense<0.000000e+00> : vector<6x128xf32>
    %182 = tpu.matmul %181, %168, %cst_83 {dimension_numbers = #tpu.dot_dimension_numbers<[1], [0], [0], [1], [0, 0, 1, 1], [], []>} : vector<6x256xbf16>, vector<256x128xbf16>, vector<6x128xf32> -> vector<6x128xf32>
    %183 = vector.broadcast %170 : vector<1x128xf32> to vector<6x128xf32>
    %184 = arith.addf %182, %183 : vector<6x128xf32>
    %185 = vector.extract_strided_slice %184 {offsets = [0, 0], sizes = [2, 128], strides = [1, 1]} : vector<6x128xf32> to vector<2x128xf32>
    %186 = arith.addf %163, %185 : vector<2x128xf32>
    %187 = vector.extract_strided_slice %184 {offsets = [2, 0], sizes = [2, 128], strides = [1, 1]} : vector<6x128xf32> to vector<2x128xf32>
    %188 = arith.addf %186, %187 : vector<2x128xf32>
    %189 = vector.extract_strided_slice %184 {offsets = [4, 0], sizes = [2, 128], strides = [1, 1]} : vector<6x128xf32> to vector<2x128xf32>
    %190 = arith.addf %188, %189 : vector<2x128xf32>
    %c1056 = arith.constant 1056 : index
    %c0_84 = arith.constant 0 : index
    %191 = vector.load %arg3[%c1056, %c0_84] : memref<1120x256xbf16, #tpu.memory_space<vmem>>, vector<64x256xbf16>
    %c6 = arith.constant 6 : index
    %c0_85 = arith.constant 0 : index
    %c0_86 = arith.constant 0 : index
    %192 = vector.load %arg4[%c6, %c0_85, %c0_86] : memref<7x1x256xf32, #tpu.memory_space<vmem>>, vector<1x1x256xf32>
    %193 = vector.shape_cast %192 : vector<1x1x256xf32> to vector<1x256xf32>
    %c6_87 = arith.constant 6 : index
    %c0_88 = arith.constant 0 : index
    %c0_89 = arith.constant 0 : index
    %194 = vector.load %arg5[%c6_87, %c0_88, %c0_89] : memref<7x256x128xbf16, #tpu.memory_space<vmem>>, vector<1x256x128xbf16>
    %195 = vector.shape_cast %194 : vector<1x256x128xbf16> to vector<256x128xbf16>
    %c6_90 = arith.constant 6 : index
    %c0_91 = arith.constant 0 : index
    %c0_92 = arith.constant 0 : index
    %196 = vector.load %arg6[%c6_90, %c0_91, %c0_92] : memref<7x1x128xf32, #tpu.memory_space<vmem>>, vector<1x1x128xf32>
    %197 = vector.shape_cast %196 : vector<1x1x128xf32> to vector<1x128xf32>
    %198 = tpu.concatenate %14, %17 in 1 : vector<2x32xf32>, vector<2x32xf32> -> vector<2x64xf32>
    %199 = tpu.concatenate %20, %26 in 1 : vector<2x32xf32>, vector<2x32xf32> -> vector<2x64xf32>
    %200 = tpu.concatenate %26, %29 in 1 : vector<2x32xf32>, vector<2x32xf32> -> vector<2x64xf32>
    %201 = tpu.concatenate %198, %199, %200 in 0 : vector<2x64xf32>, vector<2x64xf32>, vector<2x64xf32> -> vector<6x64xf32>
    %202 = arith.truncf %201 : vector<6x64xf32> to vector<6x64xbf16>
    %cst_93 = arith.constant dense<0.000000e+00> : vector<6x256xf32>
    %203 = tpu.matmul %202, %191, %cst_93 {dimension_numbers = #tpu.dot_dimension_numbers<[1], [0], [0], [1], [0, 0, 1, 1], [], []>} : vector<6x64xbf16>, vector<64x256xbf16>, vector<6x256xf32> -> vector<6x256xf32>
    %204 = vector.broadcast %193 : vector<1x256xf32> to vector<6x256xf32>
    %205 = arith.addf %203, %204 : vector<6x256xf32>
    %cst_94 = arith.constant 0.000000e+00 : f32
    %206 = vector.broadcast %cst_94 : f32 to vector<6x256xf32>
    %207 = arith.maximumf %205, %206 : vector<6x256xf32>
    %208 = arith.truncf %207 : vector<6x256xf32> to vector<6x256xbf16>
    %cst_95 = arith.constant dense<0.000000e+00> : vector<6x128xf32>
    %209 = tpu.matmul %208, %195, %cst_95 {dimension_numbers = #tpu.dot_dimension_numbers<[1], [0], [0], [1], [0, 0, 1, 1], [], []>} : vector<6x256xbf16>, vector<256x128xbf16>, vector<6x128xf32> -> vector<6x128xf32>
    %210 = vector.broadcast %197 : vector<1x128xf32> to vector<6x128xf32>
    %211 = arith.addf %209, %210 : vector<6x128xf32>
    %212 = vector.extract_strided_slice %211 {offsets = [0, 0], sizes = [2, 128], strides = [1, 1]} : vector<6x128xf32> to vector<2x128xf32>
    %213 = arith.addf %190, %212 : vector<2x128xf32>
    %214 = vector.extract_strided_slice %211 {offsets = [2, 0], sizes = [2, 128], strides = [1, 1]} : vector<6x128xf32> to vector<2x128xf32>
    %215 = arith.addf %213, %214 : vector<2x128xf32>
    %216 = vector.extract_strided_slice %211 {offsets = [4, 0], sizes = [2, 128], strides = [1, 1]} : vector<6x128xf32> to vector<2x128xf32>
    %217 = arith.addf %215, %216 : vector<2x128xf32>
    %c0_96 = arith.constant 0 : index
    %c0_97 = arith.constant 0 : index
    %218 = vector.load %arg7[%c0_96, %c0_97] : memref<2x128xf32, #tpu.memory_space<vmem>>, vector<2x128xf32>
    tpu.vector_store %arg7[%c0_96, %c0_97], %217 {strides = array<i32>} : memref<2x128xf32, #tpu.memory_space<vmem>>, vector<2x128xf32>,
    return
  }
}

</mosaic_0001>

<bundles_post_ra>
// kernel: tpu_custom_call.1
= control target key start
LH: loop header
LB: loop body
LE: loop exit
PB: predicated region body
PF: predicated region fallthrough
CT: control target
= control target key end

     0   :  { %12 = vsyncpa [#allocation3], 0  ;;  %s4598_s0 = inlined_call_operand.hbm [shape: f32[16,4,256], index: 0, kind: input, shape index: {}]   ;;  %s4599_s1 = inlined_call_operand.hbm [shape: bf16[4,32], index: 1, kind: input, shape index: {}]   ;;  %s4600_s2 = inlined_call_operand.vmem [shape: f32[1,32], index: 2, kind: input, shape index: {}]   ;;  %s4601_s3 = inlined_call_operand.hbm [shape: bf16[1120,256], index: 3, kind: input, shape index: {}]   ;;  %s4602_s4 = inlined_call_operand.vmem [shape: f32[7,1,256], index: 4, kind: input, shape index: {}]   ;;  %s4603_s5 = inlined_call_operand.hbm [shape: bf16[7,256,128], index: 5, kind: input, shape index: {}]   ;;  %s4604_s6 = inlined_call_operand.vmem [shape: f32[7,1,128], index: 6, kind: input, shape index: {}]   ;;  %s4605_s7 = inlined_call_operand.hbm [shape: f32[2,128], index: 7, kind: output, shape index: {}]  }
   0x1   :  { %13 = vsyncpa [#allocation6], 0 }
   0x2   :  { %14 = vsyncpa [#allocation9], 0 }
   0x3   :  { %15 = vsyncpa [#allocation4], 0  ;;  %s4157_s24 = smov [#allocation5]   ;;  %s4158_s26 = smov [#allocation2]  }
   0x4   :  { %s34_s25 = sshll.u32 %s4157_s24, 4  ;;  %s21_s27 = sshll.u32 %s4158_s26, 4  ;;  %s35_s25 = int_to_ptr.vmem [resolvable:$true] %s34_s25  ;;  %s4211_s27 = int_to_ptr.vmem [resolvable:$true] %s21_s27 }
   0x5   :  { %s4039_s30 = scalar_lea.hbm %s4599_s1, 32 }
   0x6   :  { %p4040_p0 = scmp.ne.s32.totalorder %s4599_s1, %s4039_s30  ;;  %p4043_p1 = scmp.lt.u32.totalorder %s4039_s30, %s4599_s1 }
   0x8   :  { %p4045_p2 = pnand %p4043_p1, %p4040_p0 }
   0xa   :  { %4048 = shalt.err (!%p4045_p2)
}
   0xb   :  { %s4049_s12 = scalar_lea.vmem %s35_s25, 32  ;;  %p4054_p4 = scmp.lt.s32.totalorder %s35_s25, %s35_s25 }
   0xc   :  { %p4050_p3 = scmp.ne.s32.totalorder %s35_s25, %s4049_s12  ;;  %p4055_p5 = scmp.lt.s32.totalorder %s4049_s12, %s4049_s12 }
   0xe   :  { %p4056_p6 = por %p4055_p5, %p4054_p4 }
  0x10   :  { %p4057_p7 = pnand %p4056_p6, %p4050_p3 }
  0x12   :  { %4060 = shalt.err (!%p4057_p7)
}
  0x13   :  { %37 = dma.hbm_to_vmem [thread:$0]  %s4599_s1, 32, %s35_s25, [#allocation6]  }
  0x14   :  { %s4061_s17 = scalar_lea.hbm %s4598_s0, 2048 }
  0x15   :  { %p4062_p8 = scmp.ne.s32.totalorder %s4598_s0, %s4061_s17  ;;  %p4065_p9 = scmp.lt.u32.totalorder %s4061_s17, %s4598_s0 }
  0x17   :  { %p4067_p10 = pnand %p4065_p9, %p4062_p8 }
  0x19   :  { %4070 = shalt.err (!%p4067_p10)
}
  0x1a   :  { %s4071_s22 = scalar_lea.vmem %s4211_s27, 2048  ;;  %p4076_p12 = scmp.lt.s32.totalorder %s4211_s27, %s4211_s27 }
  0x1b   :  { %p4072_p11 = scmp.ne.s32.totalorder %s4211_s27, %s4071_s22  ;;  %p4077_p13 = scmp.lt.s32.totalorder %s4071_s22, %s4071_s22 }
  0x1d   :  { %p4078_p0 = por %p4077_p13, %p4076_p12 }
  0x1f   :  { %p4079_p1 = pnand %p4078_p0, %p4072_p11 }
  0x21   :  { %4082 = shalt.err (!%p4079_p1)
}
  0x22   :  { %s4159_s1 = smov 128   ;;  %s4160_s23 = smov 8  }
  0x23   :  { %27 = dma.hbm_to_vmem [thread:$0]  %s4598_s0, 2048, %s4211_s27, [#allocation3], %s4159_s1, %s4159_s1, %s4160_s23  }
  0x24   :  { %s4161_s26 = smov [#allocation7]   ;;  %s4162_s29 = smov [#allocation8]  }
  0x25   :  { %s45_s28 = sshll.u32 %s4161_s26, 4  ;;  %s59_s30 = sshll.u32 %s4162_s29, 4  ;;  %s46_s28 = int_to_ptr.vmem [resolvable:$true] %s45_s28  ;;  %s4242_s30 = int_to_ptr.vmem [resolvable:$true] %s59_s30 }
  0x26   :  { %s4083_s10 = scalar_lea.hbm %s4601_s3, 17920 }
  0x27   :  { %p4084_p2 = scmp.ne.s32.totalorder %s4601_s3, %s4083_s10  ;;  %p4087_p3 = scmp.lt.u32.totalorder %s4083_s10, %s4601_s3 }
  0x29   :  { %p4089_p4 = pnand %p4087_p3, %p4084_p2 }
  0x2b   :  { %4092 = shalt.err (!%p4089_p4)
}
  0x2c   :  { %s4093_s0 = scalar_lea.vmem %s46_s28, 17920  ;;  %p4098_p6 = scmp.lt.s32.totalorder %s46_s28, %s46_s28 }
  0x2d   :  { %p4094_p5 = scmp.ne.s32.totalorder %s46_s28, %s4093_s0  ;;  %p4099_p7 = scmp.lt.s32.totalorder %s4093_s0, %s4093_s0 }
  0x2f   :  { %p4100_p8 = por %p4099_p7, %p4098_p6 }
  0x31   :  { %p4101_p9 = pnand %p4100_p8, %p4094_p5 }
  0x33   :  { %4104 = shalt.err (!%p4101_p9)
}
  0x34   :  { %51 = dma.hbm_to_vmem [thread:$0]  %s4601_s3, 17920, %s46_s28, [#allocation6], %s4159_s1, %s4159_s1, %s4160_s23  }
  0x35   :  { %s4105_s18 = scalar_lea.hbm %s4603_s5, 14336 }
  0x36   :  { %p4106_p10 = scmp.ne.s32.totalorder %s4603_s5, %s4105_s18  ;;  %p4109_p11 = scmp.lt.u32.totalorder %s4105_s18, %s4603_s5 }
  0x38   :  { %p4111_p12 = pnand %p4109_p11, %p4106_p10 }
  0x3a   :  { %4114 = shalt.err (!%p4111_p12)
}
  0x3b   :  { %s4115_s24 = scalar_lea.vmem %s4242_s30, 14336  ;;  %p4120_p0 = scmp.lt.s32.totalorder %s4242_s30, %s4242_s30 }
  0x3c   :  { %p4116_p13 = scmp.ne.s32.totalorder %s4242_s30, %s4115_s24  ;;  %p4121_p1 = scmp.lt.s32.totalorder %s4115_s24, %s4115_s24 }
  0x3e   :  { %p4122_p2 = por %p4121_p1, %p4120_p0 }
  0x40   :  { %p4123_p3 = pnand %p4122_p2, %p4116_p13 }
  0x42   :  { %4126 = shalt.err (!%p4123_p3)
}
  0x43   :  { %s4163_s3 = smov 64   ;;  %s4164_s1 = smov 4  }
  0x44   :  { %65 = dma.hbm_to_vmem [thread:$0]  %s4603_s5, 14336, %s4242_s30, [#allocation9], %s4163_s3, %s4163_s3, %s4164_s1  }
  0x45   :  { %4149 = dma.done.wait [#allocation3], 2048  }
  0x46   :  { %4150 = vsyncadd [#allocation3], 4294965248 }
  0x47   :  { %4151 = dma.done.wait [#allocation6], 17952  }
  0x48   :  { %4152 = vsyncadd [#allocation6], 4294949344 }
  0x49   :  { %4153 = dma.done.wait [#allocation9], 14336  }
  0x4a   :  { %4154 = vsyncadd [#allocation9], 4294952960  ;;  %vm145_vm0 = vcmask 1043456   ;;  %v89_v0 = vld [vmem:[#allocation2 + $0x40] sm:$0xff]  ;;  %v90_v2 = vld [vmem:[#allocation2 + $0x48] sm:$0xff]  ;;  %vm391_vm1 = vcmask 1041408  }
  0x4b   :  { %v81_v1 = vld [vmem:[#allocation2] sm:$0xff]  ;;  %v121_v3 = vcombine.high %v89_v0, %v89_v0  ;;  %v186_v4 = vsel %vm145_vm0, %v89_v0, 0.0  ;;  %v82_v7 = vld [vmem:[#allocation2 + $0x8] sm:$0xff]  ;;  %v91_v8 = vld [vmem:[#allocation2 + $0x50] sm:$0xff]  ;;  %v122_v9 = vcombine.high %v90_v2, %v90_v2  ;;  %v191_v10 = vsel %vm145_vm0, %v90_v2, 0.0  ;;  %s4168_s28 = smov 96  }
  0x4c   :  { %v113_v5 = vcombine.high %v81_v1, %v81_v1  ;;  %v146_v6 = vsel %vm145_vm0, %v81_v1, 0.0  ;;  %v114_v11 = vcombine.high %v82_v7, %v82_v7  ;;  %v83_v12 = vld [vmem:[#allocation2 + $0x10] sm:$0xff]  ;;  %v151_v15 = vsel %vm145_vm0, %v82_v7, 0.0  ;;  %v92_v17 = vld [vmem:[#allocation2 + $0x58] sm:$0xff]  ;;  %v93_v23 = vld [vmem:[#allocation2 + $0x60] sm:$0xff] }
  0x4d   :  { %v187_v13 = vsel %vm145_vm0, %v121_v3, 0.0  ;;  %v123_v16 = vcombine.high %v91_v8, %v91_v8  ;;  %v192_v20 = vsel %vm145_vm0, %v122_v9, 0.0  ;;  %v84_v22 = vld [vmem:[#allocation2 + $0x18] sm:$0xff]  ;;  %v85_v24 = vld [vmem:[#allocation2 + $0x20] sm:$0xff]  ;;  %v115_v25 = vcombine.high %v83_v12, %v83_v12  ;;  %v94_v26 = vld [vmem:[#allocation2 + $0x68] sm:$0xff] }
  0x4e   :  { %v147_v14 = vsel %vm145_vm0, %v113_v5, 0.0  ;;  %v188_v18 = vadd.f32 %v187_v13, %v186_v4  ;;  %v152_v21 = vsel %vm145_vm0, %v114_v11, 0.0  ;;  %v193_v27 = vadd.f32 %v192_v20, %v191_v10  ;;  %v86_v31 = vld [vmem:[#allocation2 + $0x28] sm:$0xff]  ;;  %v95_v36 = vld [vmem:[#allocation2 + $0x70] sm:$0xff]  ;;  %v96_v41 = vld [vmem:[#allocation2 + $0x78] sm:$0xff] }
  0x4f   :  { %v148_v19 = vadd.f32 %v147_v14, %v146_v6  ;;  %v153_v28 = vadd.f32 %v152_v21, %v151_v15  ;;  %v196_v29 = vsel %vm145_vm0, %v91_v8, 0.0  ;;  %v124_v30 = vcombine.high %v92_v17, %v92_v17  ;;  %v87_v37 = vld [vmem:[#allocation2 + $0x30] sm:$0xff]  ;;  %v88_v6 = vld [vmem:[#allocation2 + $0x38] sm:$0xff] }
  0x50   :  { %189 = vadd.xlane.f32.xlu1 %v188_v18  ;;  %v197_v32 = vsel %vm145_vm0, %v123_v16, 0.0  ;;  %v156_v33 = vsel %vm145_vm0, %v83_v12, 0.0  ;;  %v157_v34 = vsel %vm145_vm0, %v115_v25, 0.0  ;;  %v116_v35 = vcombine.high %v84_v22, %v84_v22  ;;  %v259_v16 = vld [vmem:[#allocation5] sm:$0x3] }
  0x51   :  { %149 = vadd.xlane.f32.xlu0 %v148_v19  ;;  %v201_v38 = vsel %vm145_vm0, %v92_v17, 0.0  ;;  %v202_v39 = vsel %vm145_vm0, %v124_v30, 0.0  ;;  %v125_v40 = vcombine.high %v93_v23, %v93_v23  ;;  %v117_v42 = vcombine.high %v85_v24, %v85_v24 }
  0x52   :  { %v198_v43 = vadd.f32 %v197_v32, %v196_v29  ;;  %v158_v44 = vadd.f32 %v157_v34, %v156_v33  ;;  %v161_v45 = vsel %vm145_vm0, %v84_v22, 0.0  ;;  %v126_v46 = vcombine.high %v94_v26, %v94_v26 }
  0x53   :  { %v203_v47 = vadd.f32 %v202_v39, %v201_v38  ;;  %v162_v48 = vsel %vm145_vm0, %v116_v35, 0.0  ;;  %v206_v49 = vsel %vm145_vm0, %v93_v23, 0.0  ;;  %v118_v50 = vcombine.high %v86_v31, %v86_v31 }
  0x54   :  { %194 = vadd.xlane.f32.xlu1 %v193_v27  ;;  %v207_v51 = vsel %vm145_vm0, %v125_v40, 0.0  ;;  %v166_v52 = vsel %vm145_vm0, %v85_v24, 0.0  ;;  %v127_v53 = vcombine.high %v95_v36, %v95_v36  ;;  %v119_v54 = vcombine.high %v87_v37, %v87_v37 }
  0x55   :  { %154 = vadd.xlane.f32.xlu0 %v153_v28  ;;  %v167_v55 = vsel %vm145_vm0, %v117_v42, 0.0  ;;  %v211_v56 = vsel %vm145_vm0, %v94_v26, 0.0  ;;  %v171_v57 = vsel %vm145_vm0, %v86_v31, 0.0  ;;  %v128_v58 = vcombine.high %v96_v41, %v96_v41 }
  0x56   :  { %v163_v59 = vadd.f32 %v162_v48, %v161_v45  ;;  %v212_v60 = vsel %vm145_vm0, %v126_v46, 0.0  ;;  %v172_v61 = vsel %vm145_vm0, %v118_v50, 0.0  ;;  %v216_v62 = vsel %vm145_vm0, %v95_v36, 0.0 }
  0x57   :  { %v217_v63 = vsel %vm145_vm0, %v127_v53, 0.0  ;;  %v176_v0 = vsel %vm145_vm0, %v87_v37, 0.0  ;;  %v177_v1 = vsel %vm145_vm0, %v119_v54, 0.0  ;;  %v221_v2 = vsel %vm145_vm0, %v96_v41, 0.0 }
  0x58   :  { %199 = vadd.xlane.f32.xlu1 %v198_v43  ;;  %v222_v3 = vsel %vm145_vm0, %v128_v58, 0.0  ;;  %v208_v4 = vadd.f32 %v207_v51, %v206_v49  ;;  %v168_v5 = vadd.f32 %v167_v55, %v166_v52  ;;  %v213_v7 = vadd.f32 %v212_v60, %v211_v56 }
  0x59   :  { %159 = vadd.xlane.f32.xlu0 %v158_v44  ;;  %v173_v8 = vadd.f32 %v172_v61, %v171_v57  ;;  %v120_v9 = vcombine.high %v88_v6, %v88_v6  ;;  %v218_v10 = vadd.f32 %v217_v63, %v216_v62  ;;  %v178_v11 = vadd.f32 %v177_v1, %v176_v0 }
  0x5a   :  { %v181_v12 = vsel %vm145_vm0, %v88_v6, 0.0  ;;  %v223_v14 = vadd.f32 %v222_v3, %v221_v2  ;;  %v4165_v17 = vmov 0.0   ;;  %v393_v18 = vsel %vm391_vm1, %v259_v16, 0 }
  0x5b   :  { %v182_v13 = vsel %vm145_vm0, %v120_v9, 0.0  ;;  %3651 = vmatprep.subr.bf16.mxu1 %v4165_v17  ;;  %vm4166_vm2 = vmmov 0   ;;  %v299_v25 = vlaneseq  ;;  %vm365_vm3 = vcmask 1041409  }
  0x5c   :  { %204 = vadd.xlane.f32.xlu1 %v203_v47  ;;  %v183_v15 = vadd.f32 %v182_v13, %v181_v12  ;;  %3652 = vmatpush3.bf16.msra.mxu1 %v393_v18  ;;  %vm367_vm4 = vcmask 1042434   ;;  %vm369_vm5 = vcmask 1043459   ;;  %vm371_vm6 = vcmask 1044484  }
  0x5d   :  { %164 = vadd.xlane.f32.xlu0 %v163_v59  ;;  %3653 = vmatprep.mubr.msk.bf16.mxu1 %vm4166_vm2, %v4165_v17  ;;  %v300_v32 = vand.u32 127, %v299_v25  ;;  %v4308_v33 = vshrl.u32 %v299_v25, 7  ;;  %vm373_vm7 = vcmask 1045509   ;;  %vm375_vm8 = vcmask 1046534  }
  0x5e   :  { %vm377_vm9 = vcmask 1047559   ;;  %vm387_vm10 = vcmask 31744   ;;  %vm441_vm11 = vcmask 1040384   ;;  %vm567_vm12 = vcmask 261120  }
  0x5f   :  { %v4311_v46 = vsub.s32 %v300_v32, %v4308_v33  ;;  %vm569_vm13 = vcmask 523264   ;;  %vm571_vm14 = vcmask 785408  }
  0x60   :  { %209 = vadd.xlane.f32.xlu1 %v208_v4 }
  0x61   :  { %169 = vadd.xlane.f32.xlu0 %v168_v5 }
  0x64   :  { %214 = vadd.xlane.f32.xlu1 %v213_v7 }
  0x65   :  { %174 = vadd.xlane.f32.xlu0 %v173_v8 }
  0x68   :  { %219 = vadd.xlane.f32.xlu1 %v218_v10 }
  0x69   :  { %179 = vadd.xlane.f32.xlu0 %v178_v11 }
  0x6c   :  { %224 = vadd.xlane.f32.xlu1 %v223_v14 }
  0x6d   :  { %184 = vadd.xlane.f32.xlu0 %v183_v15 }
  0xdd   :  { %v190_v19 = vpop.xlane.xlu1 %189 }
  0xde   :  { %v150_v20 = vpop.xlane.xlu0 %149  ;;  %v235_v28 = vmul.f32 0.00390625, %v190_v19 }
  0xdf   :  { %v227_v29 = vmul.f32 0.00390625, %v150_v20 }
  0xe0   :  { %v251_v36 = vpack.c.bf16 %v235_v28, %v235_v28 }
  0xe1   :  { %v195_v21 = vpop.xlane.xlu1 %194  ;;  %v243_v37 = vpack.c.bf16 %v227_v29, %v227_v29 }
  0xe2   :  { %v155_v22 = vpop.xlane.xlu0 %154  ;;  %v236_v26 = vmul.f32 0.00390625, %v195_v21  ;;  %v291_v49 = vunpack.c.l.b16 %v251_v36 }
  0xe3   :  { %v228_v27 = vmul.f32 0.00390625, %v155_v22  ;;  %v283_v50 = vunpack.c.l.b16 %v243_v37 }
  0xe4   :  { %v252_v34 = vpack.c.bf16 %v236_v26, %v236_v26  ;;  %v336_v5 = vrot.slane %v291_v49, %v4311_v46 }
  0xe5   :  { %v200_v23 = vpop.xlane.xlu1 %199  ;;  %v244_v35 = vpack.c.bf16 %v228_v27, %v228_v27  ;;  %v304_v6 = vrot.slane %v283_v50, %v4311_v46 }
  0xe6   :  { %v160_v24 = vpop.xlane.xlu0 %159  ;;  %v237_v38 = vmul.f32 0.00390625, %v200_v23  ;;  %v292_v47 = vunpack.c.l.b16 %v252_v34 }
  0xe7   :  { %v229_v39 = vmul.f32 0.00390625, %v160_v24  ;;  %v284_v48 = vunpack.c.l.b16 %v244_v35 }
  0xe8   :  { %v253_v51 = vpack.c.bf16 %v237_v38, %v237_v38  ;;  %v340_v61 = vrot.slane %v292_v47, %v4311_v46 }
  0xe9   :  { %v205_v30 = vpop.xlane.xlu1 %204  ;;  %v245_v52 = vpack.c.bf16 %v229_v39, %v229_v39  ;;  %v308_v62 = vrot.slane %v284_v48, %v4311_v46 }
  0xea   :  { %v165_v31 = vpop.xlane.xlu0 %164  ;;  %v238_v42 = vmul.f32 0.00390625, %v205_v30  ;;  %v293_v1 = vunpack.c.l.b16 %v253_v51  ;;  %v379_v13 = vsel %vm365_vm3, %v340_v61, %v336_v5  ;;  %v3723_v61 = vld [vmem:[#allocation7 + $0x20] ss:$8 sps:$4 sm:$0xff]   ;;  %v3740_v5 = vld [vmem:[#allocation7 + $0x74] ss:$8 sps:$4 sm:$0xff]  }
  0xeb   :  { %v230_v43 = vmul.f32 0.00390625, %v165_v31  ;;  %v285_v2 = vunpack.c.l.b16 %v245_v52  ;;  %v366_v14 = vsel %vm365_vm3, %v308_v62, %v304_v6  ;;  %v3726_v62 = vld [vmem:[#allocation7 + $0x30] ss:$8 sps:$4 sm:$0xff]  }
  0xec   :  { %v254_v55 = vpack.c.bf16 %v238_v42, %v238_v42  ;;  %v344_v17 = vrot.slane %v293_v1, %v4311_v46  ;;  %v3734_v1 = vld [vmem:[#allocation7 + $0x54] ss:$8 sps:$4 sm:$0xff]   ;;  %v3738_v6 = vld [vmem:[#allocation7 + $0x70] ss:$8 sps:$4 sm:$0xff]  }
  0xed   :  { %v210_v40 = vpop.xlane.xlu1 %209  ;;  %v246_v56 = vpack.c.bf16 %v230_v43, %v230_v43  ;;  %v312_v18 = vrot.slane %v285_v2, %v4311_v46  ;;  %v3732_v2 = vld [vmem:[#allocation7 + $0x50] ss:$8 sps:$4 sm:$0xff]  }
  0xee   :  { %v170_v41 = vpop.xlane.xlu0 %169  ;;  %v239_v44 = vmul.f32 0.00390625, %v210_v40  ;;  %v294_v7 = vunpack.c.l.b16 %v254_v55  ;;  %v380_v36 = vsel %vm367_vm4, %v344_v17, %v379_v13  ;;  %v3752_v13 = vld [vmem:[#allocation7 + $0xb4] ss:$8 sps:$4 sm:$0xff]  }
  0xef   :  { %v231_v45 = vmul.f32 0.00390625, %v170_v41  ;;  %v286_v8 = vunpack.c.l.b16 %v246_v56  ;;  %v368_v37 = vsel %vm367_vm4, %v312_v18, %v366_v14  ;;  %v3717_v56 = vld [vmem:[#allocation7] ss:$8 sps:$4 sm:$0xff]   ;;  %v3750_v14 = vld [vmem:[#allocation7 + $0xb0] ss:$8 sps:$4 sm:$0xff]  }
  0xf0   :  { %v255_v59 = vpack.c.bf16 %v239_v44, %v239_v44  ;;  %v348_v23 = vrot.slane %v294_v7, %v4311_v46  ;;  %v3743_v7 = vld [vmem:[#allocation7 + $0x84] ss:$8 sps:$4 sm:$0xff]   ;;  %v3758_v17 = vld [vmem:[#allocation7 + $0xd4] ss:$8 sps:$4 sm:$0xff]   ;;  %v3756_v18 = vld [vmem:[#allocation7 + $0xd0] ss:$8 sps:$4 sm:$0xff]  }
  0xf1   :  { %v215_v53 = vpop.xlane.xlu1 %214  ;;  %v247_v60 = vpack.c.bf16 %v231_v45, %v231_v45  ;;  %v316_v24 = vrot.slane %v286_v8, %v4311_v46  ;;  %v3741_v8 = vld [vmem:[#allocation7 + $0x80] ss:$8 sps:$4 sm:$0xff]  }
  0xf2   :  { %v175_v54 = vpop.xlane.xlu0 %174  ;;  %v240_v57 = vmul.f32 0.00390625, %v215_v53  ;;  %v295_v9 = vunpack.c.l.b16 %v255_v59  ;;  %v381_v40 = vsel %vm369_vm5, %v348_v23, %v380_v36  ;;  %v3720_v59 = vld [vmem:[#allocation7 + $0x10] ss:$8 sps:$4 sm:$0xff]  }
  0xf3   :  { %v232_v58 = vmul.f32 0.00390625, %v175_v54  ;;  %v287_v10 = vunpack.c.l.b16 %v247_v60  ;;  %v370_v41 = vsel %vm369_vm5, %v316_v24, %v368_v37  ;;  %v3725_v60 = vld [vmem:[#allocation7 + $0x24] ss:$8 sps:$4 sm:$0xff]   ;;  %v3759_v24 = vld [vmem:[#allocation7 + $0xe0] ss:$8 sps:$4 sm:$0xff]  }
  0xf4   :  { %v256_v63 = vpack.c.bf16 %v240_v57, %v240_v57  ;;  %v352_v27 = vrot.slane %v295_v9, %v4311_v46  ;;  %v3719_v57 = vld [vmem:[#allocation7 + $0x4] ss:$8 sps:$4 sm:$0xff]   ;;  %v3746_v9 = vld [vmem:[#allocation7 + $0x94] ss:$8 sps:$4 sm:$0xff]   ;;  %v3762_v37 = vld [vmem:[#allocation7 + $0xf0] ss:$8 sps:$4 sm:$0xff]  }
  0xf5   :  { %v248_v0 = vpack.c.bf16 %v232_v58, %v232_v58  ;;  %v220_v3 = vpop.xlane.xlu1 %219  ;;  %v320_v28 = vrot.slane %v287_v10, %v4311_v46  ;;  %v3722_v58 = vld [vmem:[#allocation7 + $0x14] ss:$8 sps:$4 sm:$0xff]   ;;  %749 = vmatprep.subr.bf16.mxu1 %v3719_v57  ;;  %v3744_v10 = vld [vmem:[#allocation7 + $0x90] ss:$8 sps:$4 sm:$0xff]  }
  0xf6   :  { %v180_v4 = vpop.xlane.xlu0 %179  ;;  %v241_v11 = vmul.f32 0.00390625, %v220_v3  ;;  %v296_v15 = vunpack.c.l.b16 %v256_v63  ;;  %v382_v44 = vsel %vm371_vm6, %v352_v27, %v381_v40  ;;  %v3731_v63 = vld [vmem:[#allocation7 + $0x44] ss:$8 sps:$4 sm:$0xff]  }
  0xf7   :  { %v233_v12 = vmul.f32 0.00390625, %v180_v4  ;;  %v288_v16 = vunpack.c.l.b16 %v248_v0  ;;  %v372_v45 = vsel %vm371_vm6, %v320_v28, %v370_v41  ;;  %v3729_v0 = vld [vmem:[#allocation7 + $0x40] ss:$8 sps:$4 sm:$0xff]   ;;  %v3737_v3 = vld [vmem:[#allocation7 + $0x64] ss:$8 sps:$4 sm:$0xff]  }
  0xf8   :  { %v257_v19 = vpack.c.bf16 %v241_v11, %v241_v11  ;;  %v356_v31 = vrot.slane %v296_v15, %v4311_v46  ;;  %v3735_v4 = vld [vmem:[#allocation7 + $0x60] ss:$8 sps:$4 sm:$0xff]   ;;  %v3749_v11 = vld [vmem:[#allocation7 + $0xa4] ss:$8 sps:$4 sm:$0xff]  }
  0xf9   :  { %v249_v20 = vpack.c.bf16 %v233_v12, %v233_v12  ;;  %v225_v21 = vpop.xlane.xlu1 %224  ;;  %v324_v32 = vrot.slane %v288_v16, %v4311_v46  ;;  %v3747_v12 = vld [vmem:[#allocation7 + $0xa0] ss:$8 sps:$4 sm:$0xff]   ;;  %v3755_v15 = vld [vmem:[#allocation7 + $0xc4] ss:$8 sps:$4 sm:$0xff]  }
  0xfa   :  { %v185_v22 = vpop.xlane.xlu0 %184  ;;  %v242_v25 = vmul.f32 0.00390625, %v225_v21  ;;  %v297_v29 = vunpack.c.l.b16 %v257_v19  ;;  %v383_v47 = vsel %vm373_vm7, %v356_v31, %v382_v44  ;;  %v3753_v16 = vld [vmem:[#allocation7 + $0xc0] ss:$8 sps:$4 sm:$0xff]   ;;  %v3217_v19 = vld [vmem:[%s4600_s2] ss:$0 sm:$0xff]  ;;  %s4167_s2 = smov 32  }
  0xfb   :  { %v234_v26 = vmul.f32 0.00390625, %v185_v22  ;;  %v289_v30 = vunpack.c.l.b16 %v249_v20  ;;  %v374_v48 = vsel %vm373_vm7, %v324_v32, %v372_v45 }
  0xfc   :  { %v258_v34 = vpack.c.bf16 %v242_v25, %v242_v25  ;;  %v360_v38 = vrot.slane %v297_v29, %v4311_v46  ;;  %v3761_v25 = vld [vmem:[#allocation7 + $0xe4] ss:$8 sps:$4 sm:$0xff]  }
  0xfd   :  { %v250_v35 = vpack.c.bf16 %v234_v26, %v234_v26  ;;  %v328_v39 = vrot.slane %v289_v30, %v4311_v46 }
  0xfe   :  { %v298_v42 = vunpack.c.l.b16 %v258_v34  ;;  %v384_v51 = vsel %vm375_vm8, %v360_v38, %v383_v47 }
  0xff   :  { %v290_v43 = vunpack.c.l.b16 %v250_v35  ;;  %v376_v52 = vsel %vm375_vm8, %v328_v39, %v374_v48 }
 0x100   :  { %v364_v49 = vrot.slane %v298_v42, %v4311_v46  ;;  %v3764_v42 = vld [vmem:[#allocation7 + $0xf4] ss:$8 sps:$4 sm:$0xff]  }
 0x101   :  { %v332_v50 = vrot.slane %v290_v43, %v4311_v46  ;;  %v3728_v46 = vld [vmem:[#allocation7 + $0x34] ss:$8 sps:$4 sm:$0xff]  }
 0x102   :  { %v385_v53 = vsel %vm377_vm9, %v364_v49, %v384_v51 }
 0x103   :  { %v378_v54 = vsel %vm377_vm9, %v332_v50, %v376_v52 }
 0x104   :  { %v386_v55 = vpack.c.b16 %v385_v53, %v378_v54 }
 0x106   :  { %3654 = vmatmul.mubr.msk.bf16.vlgmr.msra.gmra.mrb[0].mxu1 %vm387_vm10, %v386_v55 }
 0x107   :  { %750 = vmatpush1.bf16.msra.mxu1 %v3717_v56 }
 0x108   :  { %751 = vmatprep.subr.bf16.mxu1 %v3722_v58 }
 0x10b   :  { %752 = vmatpush1.bf16.msra.mxu1 %v3720_v59 }
 0x10c   :  { %753 = vmatprep.subr.bf16.mxu1 %v3725_v60 }
 0x10f   :  { %754 = vmatpush1.bf16.msra.mxu1 %v3723_v61 }
 0x110   :  { %755 = vmatprep.subr.bf16.mxu1 %v3728_v46 }
 0x113   :  { %756 = vmatpush1.bf16.msra.mxu1 %v3726_v62  ;;  %v3765_v62 = vld [vmem:[#allocation8 + $0x40] sm:$0xff]  }
 0x114   :  { %757 = vmatprep.subr.bf16.mxu1 %v3731_v63  ;;  %v3766_v63 = vld [vmem:[#allocation8] sm:$0xff]   ;;  %3497 = vmatprep.subr.bf16.mxu0 %v3765_v62 }
 0x115   :  { %3498 = vmatpush3.bf16.msra.mxu0 %v3766_v63 }
 0x117   :  { %758 = vmatpush1.bf16.msra.mxu1 %v3729_v0  ;;  %v3767_v0 = vld [vmem:[#allocation8 + $0x48] sm:$0xff]  }
 0x118   :  { %759 = vmatprep.subr.bf16.mxu1 %v3734_v1  ;;  %3499 = vmatprep.subr.bf16.mxu0 %v3767_v0 }
 0x11b   :  { %760 = vmatpush1.bf16.msra.mxu1 %v3732_v2  ;;  %v3768_v2 = vld [vmem:[#allocation8 + $0x8] sm:$0xff]  }
 0x11c   :  { %761 = vmatprep.subr.bf16.mxu1 %v3737_v3  ;;  %v3769_v3 = vld [vmem:[#allocation8 + $0x50] sm:$0xff]   ;;  %3500 = vmatpush3.bf16.msra.mxu0 %v3768_v2 }
 0x11d   :  { %3501 = vmatprep.subr.bf16.mxu0 %v3769_v3 }
 0x11f   :  { %762 = vmatpush1.bf16.msra.mxu1 %v3735_v4  ;;  %v3770_v4 = vld [vmem:[#allocation8 + $0x10] sm:$0xff]  }
 0x120   :  { %763 = vmatprep.subr.bf16.mxu1 %v3740_v5  ;;  %v3771_v5 = vld [vmem:[#allocation8 + $0x58] sm:$0xff]   ;;  %3502 = vmatpush3.bf16.msra.mxu0 %v3770_v4 }
 0x121   :  { %3503 = vmatprep.subr.bf16.mxu0 %v3771_v5 }
 0x123   :  { %764 = vmatpush1.bf16.msra.mxu1 %v3738_v6  ;;  %v3772_v6 = vld [vmem:[#allocation8 + $0x18] sm:$0xff]  }
 0x124   :  { %765 = vmatprep.subr.bf16.mxu1 %v3743_v7  ;;  %v3773_v7 = vld [vmem:[#allocation8 + $0x60] sm:$0xff]   ;;  %3504 = vmatpush3.bf16.msra.mxu0 %v3772_v6 }
 0x125   :  { %3505 = vmatprep.subr.bf16.mxu0 %v3773_v7 }
 0x127   :  { %766 = vmatpush1.bf16.msra.mxu1 %v3741_v8  ;;  %v3774_v8 = vld [vmem:[#allocation8 + $0x20] sm:$0xff]  }
 0x128   :  { %767 = vmatprep.subr.bf16.mxu1 %v3746_v9  ;;  %v3775_v9 = vld [vmem:[#allocation8 + $0x68] sm:$0xff]   ;;  %3506 = vmatpush3.bf16.msra.mxu0 %v3774_v8 }
 0x129   :  { %3507 = vmatprep.subr.bf16.mxu0 %v3775_v9 }
 0x12b   :  { %768 = vmatpush1.bf16.msra.mxu1 %v3744_v10  ;;  %v3776_v10 = vld [vmem:[#allocation8 + $0x28] sm:$0xff]  }
 0x12c   :  { %769 = vmatprep.subr.bf16.mxu1 %v3749_v11  ;;  %3508 = vmatpush3.bf16.msra.mxu0 %v3776_v10 }
 0x12f   :  { %770 = vmatpush1.bf16.msra.mxu1 %v3747_v12 }
 0x130   :  { %771 = vmatprep.subr.bf16.mxu1 %v3752_v13 }
 0x133   :  { %772 = vmatpush1.bf16.msra.mxu1 %v3750_v14 }
 0x134   :  { %773 = vmatprep.subr.bf16.mxu1 %v3755_v15 }
 0x137   :  { %774 = vmatpush1.bf16.msra.mxu1 %v3753_v16 }
 0x138   :  { %775 = vmatprep.subr.bf16.mxu1 %v3758_v17 }
 0x13b   :  { %776 = vmatpush1.bf16.msra.mxu1 %v3756_v18 }
 0x13c   :  { %777 = vmatprep.subr.bf16.mxu1 %v3761_v25 }
 0x13f   :  { %778 = vmatpush1.bf16.msra.mxu1 %v3759_v24 }
 0x140   :  { %779 = vmatprep.subr.bf16.mxu1 %v3764_v42 }
 0x143   :  { %780 = vmatpush1.bf16.msra.mxu1 %v3762_v37 }
 0x1d9   :  { %v429_v20 = vpop.f32.mrb[0].mxu1 }
 0x1da   :  { %v430_v21 = vadd.f32 %v3217_v19, %v429_v20  ;;  %v3655_v22 = vpop.f32.mrb[1].mxu1 }
 0x1db   :  { %v432_v23 = vpop.f32.mrb[2].mxu1 }
 0x1dc   :  { %v436_v26 = vmax.f32 %v430_v21, 0.0  ;;  %v433_v27 = vadd.f32 %v3217_v19, %v432_v23  ;;  %v3656_v28 = vpop.f32.mrb[3].mxu1 }
 0x1de   :  { %v437_v29 = vmax.f32 %v433_v27, 0.0  ;;  %v447_v30 = vrot.slane %v436_v26, 2  ;;  %v444_v31 = vrot.slane %v436_v26, 1  ;;  %v467_v32 = vrot.slane %v436_v26, 6 }
 0x1df   :  { %v462_v34 = vrot.slane %v436_v26, 5  ;;  %v452_v35 = vrot.slane %v436_v26, 3  ;;  %v472_v36 = vrot.slane %v436_v26, 7  ;;  %v457_v51 = vrot.slane %v436_v26, 4 }
 0x1e0   :  { %v449_v38 = vrot.slane %v437_v29, 1  ;;  %v469_v39 = vrot.slane %v437_v29, 5  ;;  %v4345_v40 = vsel %vm441_vm11, %v444_v31, %v437_v29  ;;  %v464_v41 = vrot.slane %v437_v29, 4 }
 0x1e1   :  { %v454_v43 = vrot.slane %v437_v29, 2  ;;  %v474_v44 = vrot.slane %v437_v29, 6  ;;  %v459_v45 = vrot.slane %v437_v29, 3  ;;  %v439_v47 = vrot.slane %v437_v29, 7 }
 0x1e2   :  { %v4348_v48 = vsel %vm441_vm11, %v447_v30, %v449_v38  ;;  %v471_v49 = vsel %vm441_vm11, %v467_v32, %v469_v39  ;;  %v4352_v50 = vsel %vm441_vm11, %v462_v34, %v464_v41 }
 0x1e3   :  { %v3676_v52 = vpack.i.bf16 %v4348_v48, %v471_v49  ;;  %v3671_v53 = vpack.i.bf16 %v4345_v40, %v4352_v50  ;;  %v456_v54 = vsel %vm441_vm11, %v452_v35, %v454_v43  ;;  %v1885_v55 = vrot.slane %v471_v49, 4 }
 0x1e4   :  { %v476_v56 = vsel %vm441_vm11, %v472_v36, %v474_v44  ;;  %v4360_v57 = vsel %vm441_vm11, %v457_v51, %v459_v45  ;;  %v4364_v59 = vsel %vm441_vm11, %v436_v26, %v439_v47  ;;  %v1880_v60 = vrot.slane %v4352_v50, 6 }
 0x1e5   :  { %3677 = vrot.lane.b32.xlu1 %v3676_v52, %s4163_s3  ;;  %3672 = vrot.lane.b32.xlu0 %v3671_v53, %s4167_s2  ;;  %v3681_v58 = vpack.i.bf16 %v456_v54, %v476_v56  ;;  %v3696_v1 = vpack.i.bf16 %v471_v49, %v4352_v50 }
 0x1e6   :  { %v1889_v61 = vsel %vm391_vm1, %v476_v56, %v1880_v60 }
 0x1e7   :  { %v4369_v46 = vsel %vm145_vm0, %v1889_v61, %v1885_v55 }
 0x1e9   :  { %3682 = vrot.lane.b32.xlu1 %v3681_v58, %s4168_s28  ;;  %3692 = vrot.lane.b32.xlu0 %v3681_v58, %s4163_s3 }
 0x1ed   :  { %3687 = vrot.lane.b32.xlu1 %v3676_v52, %s4167_s2  ;;  %1454 = vrot.lane.b32.xlu0 %v476_v56, %s4167_s2 }
 0x1f1   :  { %1003 = vrot.lane.b32.xlu1 %v4360_v57, %s4168_s28  ;;  %1861 = vrot.lane.b32.xlu0 %v4360_v57, %s4163_s3 }
 0x1f5   :  { %1870 = vrot.lane.b32.xlu1 %v456_v54, %s4167_s2  ;;  %2257 = vrot.lane.b32.xlu0 %v4352_v50, %s4163_s3 }
 0x1f9   :  { %3697 = vrot.lane.b32.xlu1 %v3696_v1, %s4168_s28  ;;  %s4170_s28 = smov [#allocation10]  }
 0x1fa   :  { %s3206_s29 = sshll.u32 %s4170_s28, 4  ;;  %s3207_s29 = int_to_ptr.vmem [resolvable:$true] %s3206_s29 }
 0x1fb   :  { %s4127_s30 = scalar_lea.vmem %s3207_s29, 32  ;;  %p4132_p5 = scmp.lt.s32.totalorder %s3207_s29, %s3207_s29 }
 0x1fc   :  { %p4128_p4 = scmp.ne.s32.totalorder %s3207_s29, %s4127_s30  ;;  %p4133_p6 = scmp.lt.s32.totalorder %s4127_s30, %s4127_s30 }
 0x1fd   :  { %2937 = vrot.lane.b32.xlu1 %v4360_v57, %s4167_s2 }
 0x1fe   :  { %p4134_p7 = por %p4133_p6, %p4132_p5 }
 0x200   :  { %p4135_p8 = pnand %p4134_p7, %p4128_p4 }
 0x257   :  { %v3678_v11 = vpop.permute.xlu1 %3677  ;;  %v3673_v12 = vpop.permute.xlu0 %3672 }
 0x258   :  { %v3675_v13 = vunpack.i.h.bf16 %v3673_v12  ;;  %v3674_v14 = vunpack.i.l.bf16 %v3673_v12  ;;  %v3680_v15 = vunpack.i.h.bf16 %v3678_v11  ;;  %v3679_v16 = vunpack.i.l.bf16 %v3678_v11 }
 0x25a   :  { %v4381_v17 = vsel %vm567_vm12, %v4364_v59, %v3675_v13  ;;  %v4385_v18 = vsel %vm567_vm12, %v4360_v57, %v3674_v14  ;;  %v2612_v24 = vsel %vm567_vm12, %v4348_v48, %v3674_v14 }
 0x25b   :  { %v3683_v19 = vpop.permute.xlu1 %3682  ;;  %v3693_v20 = vpop.permute.xlu0 %3692  ;;  %v570_v25 = vsel %vm569_vm13, %v4381_v17, %v3680_v15  ;;  %v574_v26 = vsel %vm569_vm13, %v4385_v18, %v3679_v16 }
 0x25c   :  { %v3685_v21 = vunpack.i.h.bf16 %v3683_v19  ;;  %v3684_v22 = vunpack.i.l.bf16 %v3683_v19  ;;  %v4387_v23 = vunpack.i.l.bf16 %v3693_v20  ;;  %v3695_v30 = vunpack.i.h.bf16 %v3693_v20 }
 0x25d   :  { %v2945_v19 = vrot.slane %v4385_v18, 4 }
 0x25e   :  { %v4396_v27 = vsel %vm571_vm14, %v570_v25, %v3685_v21  ;;  %v2613_v28 = vsel %vm569_vm13, %v2612_v24, %v4387_v23  ;;  %v575_v29 = vsel %vm571_vm14, %v574_v26, %v3684_v22  ;;  %v1018_v41 = vsel %vm569_vm13, %v4381_v17, %v3695_v30  ;;  %v3778_v24 = vld [vmem:[#allocation8 + $0x30] sm:$0xff]   ;;  %v3780_v26 = vld [vmem:[#allocation8 + $0x38] sm:$0xff]  }
 0x25f   :  { %v4401_v31 = vpop.permute.xlu1 %3687  ;;  %v4403_v32 = vpop.permute.xlu0 %1454  ;;  %v577_v34 = vpack.c.bf16 %v575_v29, %v575_v29  ;;  %v576_v36 = vpack.c.bf16 %v4396_v27, %v4396_v27  ;;  %v2618_v4 = vrot.slane %v2613_v28, 4  ;;  %v3783_v28 = vld [vmem:[#allocation7 + $0x104] ss:$8 sps:$4 sm:$0xff]   ;;  %v4474_v29 = vsub.s32 0, %v4308_v33 }
 0x260   :  { %v3690_v35 = vunpack.i.h.bf16 %v4401_v31 }
 0x261   :  { %781 = vmatprep.mubr.bf16.mxu1 %v577_v34  ;;  %v4480_v34 = vsub.s32 1, %v4308_v33 }
 0x262   :  { %v1023_v37 = vsel %vm567_vm12, %v4345_v40, %v3690_v35  ;;  %782 = vmatmul.mubr.bf16.vlgmr.msra.gmra.mrb[4].mxu1 %v576_v36  ;;  %v1867_v38 = vsel %vm567_vm12, %v4364_v59, %v3690_v35 }
 0x263   :  { %v1004_v39 = vpop.permute.xlu1 %1003  ;;  %v1024_v42 = vsel %vm569_vm13, %v1023_v37, %v3695_v30  ;;  %v4415_v43 = vpop.permute.xlu0 %1861  ;;  %v509_v30 = vld [vmem:[%s4602_s4] sm:$0x3] }
 0x264   :  { %v1019_v44 = vsel %vm571_vm14, %v1018_v41, %v1004_v39  ;;  %v2256_v47 = vsel %vm571_vm14, %v1024_v42, %v3684_v22  ;;  %v1012_v49 = vsel %vm571_vm14, %v570_v25, %v1004_v39  ;;  %v4437_v63 = vsel %vm571_vm14, %v1024_v42, %v1004_v39  ;;  %v3779_v25 = vld [vmem:[#allocation8 + $0x78] sm:$0xff]  }
 0x265   :  { %v1028_v45 = vrot.slane %v1019_v44, 6  ;;  %v1879_v7 = vrot.slane %v4437_v63, 6  ;;  %v1868_v8 = vsel %vm569_vm13, %v1867_v38, %v4415_v43  ;;  %v582_v36 = vrot.slane %v509_v30, %v4474_v29 }
 0x266   :  { %v586_v38 = vrot.slane %v509_v30, %v4480_v34  ;;  %v3822_v30 = vld [vmem:[#allocation7 + $0x1d4] ss:$8 sps:$4 sm:$0xff]  }
 0x267   :  { %v4421_v51 = vsel %vm391_vm1, %v1012_v49, %v1028_v45  ;;  %v1871_v52 = vpop.permute.xlu1 %1870  ;;  %v2258_v53 = vpop.permute.xlu0 %2257 }
 0x268   :  { %v4425_v54 = vsel %vm567_vm12, %v4348_v48, %v1871_v52  ;;  %v2262_v55 = vsel %vm567_vm12, %v4345_v40, %v1871_v52  ;;  %v2609_v56 = vsel %vm567_vm12, %v4364_v59, %v1871_v52  ;;  %v2260_v58 = vsel %vm569_vm13, %v1023_v37, %v2258_v53 }
 0x269   :  { %v2610_v60 = vsel %vm569_vm13, %v2609_v56, %v4387_v23  ;;  %v2261_v61 = vsel %vm571_vm14, %v2260_v58, %v3684_v22  ;;  %v2263_v62 = vsel %vm569_vm13, %v2262_v55, %v2258_v53  ;;  %v2611_v40 = vsel %vm569_vm13, %v4425_v54, %v2258_v53  ;;  %v3786_v58 = vld [vmem:[#allocation7 + $0x114] ss:$8 sps:$4 sm:$0xff]  }
 0x26a   :  { %v2264_v0 = vsel %vm571_vm14, %v2263_v62, %v3684_v22  ;;  %v2266_v1 = vrot.slane %v2261_v61, 6  ;;  %v2615_v59 = vrot.slane %v2611_v40, 6  ;;  %v3777_v22 = vld [vmem:[#allocation8 + $0x70] sm:$0xff]   ;;  %v3789_v62 = vld [vmem:[#allocation7 + $0x124] ss:$8 sps:$4 sm:$0xff]  }
 0x26b   :  { %v2269_v2 = vrot.slane %v2264_v0, 4  ;;  %v4442_v3 = vpop.permute.xlu1 %3697  ;;  %3509 = vmatprep.subr.bf16.mxu0 %v3777_v22  ;;  %v3784_v61 = vld [vmem:[#allocation7 + $0x110] ss:$8 sps:$4 sm:$0xff]   ;;  %v3787_v0 = vld [vmem:[#allocation7 + $0x120] ss:$8 sps:$4 sm:$0xff]  }
 0x26c   :  { %v2271_v5 = vsel %vm391_vm1, %v2256_v47, %v2266_v1  ;;  %v3700_v6 = vunpack.i.h.bf16 %v4442_v3  ;;  %v2620_v9 = vsel %vm391_vm1, %v2610_v60, %v2615_v59  ;;  %3510 = vmatpush3.bf16.msra.mxu0 %v3778_v24  ;;  %v3792_v1 = vld [vmem:[#allocation7 + $0x134] ss:$8 sps:$4 sm:$0xff]   ;;  %v3790_v40 = vld [vmem:[#allocation7 + $0x130] ss:$8 sps:$4 sm:$0xff]   ;;  %v3793_v59 = vld [vmem:[#allocation7 + $0x140] ss:$8 sps:$4 sm:$0xff]  }
 0x26d   :  { %v4451_v10 = vsel %vm145_vm0, %v2271_v5, %v2269_v2  ;;  %v4454_v11 = vsel %vm145_vm0, %v2620_v9, %v2618_v4  ;;  %3511 = vmatprep.subr.bf16.mxu0 %v3779_v25  ;;  %v3795_v2 = vld [vmem:[#allocation7 + $0x144] ss:$8 sps:$4 sm:$0xff]   ;;  %v3798_v4 = vld [vmem:[#allocation7 + $0x154] ss:$8 sps:$4 sm:$0xff]   ;;  %v3796_v5 = vld [vmem:[#allocation7 + $0x150] ss:$8 sps:$4 sm:$0xff]  }
 0x26e   :  { %v1869_v12 = vsel %vm571_vm14, %v1868_v8, %v3700_v6  ;;  %v3801_v6 = vld [vmem:[#allocation7 + $0x164] ss:$8 sps:$4 sm:$0xff]   ;;  %v3804_v8 = vld [vmem:[#allocation7 + $0x174] ss:$8 sps:$4 sm:$0xff]   ;;  %v3802_v9 = vld [vmem:[#allocation7 + $0x170] ss:$8 sps:$4 sm:$0xff]  }
 0x26f   :  { %v4458_v13 = vsel %vm391_vm1, %v1869_v12, %v1879_v7  ;;  %v2938_v14 = vpop.permute.xlu1 %2937  ;;  %v3799_v7 = vld [vmem:[#allocation7 + $0x160] ss:$8 sps:$4 sm:$0xff]   ;;  %v3807_v12 = vld [vmem:[#allocation7 + $0x184] ss:$8 sps:$4 sm:$0xff]   ;;  %v3816_v22 = vld [vmem:[#allocation7 + $0x1b4] ss:$8 sps:$4 sm:$0xff]  }
 0x270   :  { %v2940_v15 = vsel %vm567_vm12, %v4348_v48, %v2938_v14  ;;  %3512 = vmatpush3.bf16.msra.mxu0 %v3780_v26  ;;  %v3689_v48 = vunpack.i.l.bf16 %v4401_v31  ;;  %v3805_v14 = vld [vmem:[#allocation7 + $0x180] ss:$8 sps:$4 sm:$0xff]   ;;  %v3814_v24 = vld [vmem:[#allocation7 + $0x1b0] ss:$8 sps:$4 sm:$0xff]   ;;  %v3819_v26 = vld [vmem:[#allocation7 + $0x1c4] ss:$8 sps:$4 sm:$0xff]  }
 0x271   :  { %v2942_v16 = vrot.slane %v2940_v15, 6  ;;  %1197 = vmatprep.subr.bf16.mxu0 %v3783_v28  ;;  %v3810_v15 = vld [vmem:[#allocation7 + $0x194] ss:$8 sps:$4 sm:$0xff]   ;;  %v3820_v31 = vld [vmem:[#allocation7 + $0x1d0] ss:$8 sps:$4 sm:$0xff]  }
 0x272   :  { %v1453_v25 = vsel %vm567_vm12, %v4360_v57, %v3689_v48 }
 0x273   :  { %v2947_v20 = vsel %vm391_vm1, %v4381_v17, %v2942_v16  ;;  %v1013_v17 = vsel %vm567_vm12, %v4352_v50, %v3689_v48  ;;  %v3808_v16 = vld [vmem:[#allocation7 + $0x190] ss:$8 sps:$4 sm:$0xff]   ;;  %v1461_v28 = vrot.slane %v1453_v25, 6  ;;  %v3825_v48 = vld [vmem:[#allocation7 + $0x1e4] ss:$8 sps:$4 sm:$0xff]  }
 0x274   :  { %v4466_v21 = vsel %vm145_vm0, %v2947_v20, %v2945_v19  ;;  %v1014_v35 = vsel %vm569_vm13, %v1013_v17, %v4387_v23  ;;  %v3781_v23 = vld [vmem:[#allocation7 + $0x100] ss:$8 sps:$4 sm:$0xff]   ;;  %v3813_v19 = vld [vmem:[#allocation7 + $0x1a4] ss:$8 sps:$4 sm:$0xff]  }
 0x275   :  { %v1029_v37 = vrot.slane %v1014_v35, 6  ;;  %v1034_v50 = vrot.slane %v1014_v35, 4  ;;  %v3811_v20 = vld [vmem:[#allocation7 + $0x1a0] ss:$8 sps:$4 sm:$0xff]  }
 0x276   :  { %v3817_v17 = vld [vmem:[#allocation7 + $0x1c0] ss:$8 sps:$4 sm:$0xff]  }
 0x277   :  { %v1038_v47 = vsel %vm391_vm1, %v1014_v35, %v1029_v37  ;;  %v1457_v35 = vsel %vm567_vm12, %v4360_v57, %v4403_v32  ;;  %v1470_v37 = vsel %vm391_vm1, %v4385_v18, %v1461_v28  ;;  %v3828_v57 = vld [vmem:[#allocation7 + $0x1f4] ss:$8 sps:$4 sm:$0xff]   ;;  %v3826_v18 = vld [vmem:[#allocation7 + $0x1f0] ss:$8 sps:$4 sm:$0xff]   ;;  %v3869_v25 = vld [vmem:[#allocation8 + $0xe8] sm:$0xff]  }
 0x278   :  { %v1040_v53 = vsel %vm145_vm0, %v1038_v47, %v1034_v50  ;;  %v3837_v47 = vld [vmem:[#allocation7 + $0x224] ss:$8 sps:$4 sm:$0xff]   ;;  %v3872_v28 = vld [vmem:[#allocation8 + $0xb0] sm:$0xff]  }
 0x279   :  { %v1042_v60 = vpack.c.bf16 %v1040_v53, %v1040_v53  ;;  %v3843_v53 = vld [vmem:[#allocation7 + $0x244] ss:$8 sps:$4 sm:$0xff]  }
 0x335   :  { %v783_v39 = vpop.f32.mrb[4].mxu1 }
 0x336   :  { %v784_v41 = vadd.f32 %v783_v39, %v582_v36  ;;  %v785_v42 = vpop.f32.mrb[5].mxu1  ;;  %v1033_v36 = vrot.slane %v4437_v63, 4  ;;  %v3831_v63 = vld [vmem:[#allocation7 + $0x204] ss:$8 sps:$4 sm:$0xff]  }
 0x337   :  { %v786_v44 = vadd.f32 %v785_v42, %v586_v38  ;;  %v787_v45 = vpop.f32.mrb[6].mxu1  ;;  %v1466_v38 = vrot.slane %v1457_v35, 4  ;;  %v3875_v35 = vld [vmem:[#allocation8 + $0x140] sm:$0xff]  }
 0x338   :  { %v790_v49 = vmax.f32 %v784_v41, 0.0  ;;  %v788_v52 = vpop.f32.mrb[7].mxu1  ;;  %v1039_v39 = vsel %vm145_vm0, %v4421_v51, %v1033_v36  ;;  %v3823_v41 = vld [vmem:[#allocation7 + $0x1e0] ss:$8 sps:$4 sm:$0xff]   ;;  %v3834_v45 = vld [vmem:[#allocation7 + $0x214] ss:$8 sps:$4 sm:$0xff]  }
 0x339   :  { %v791_v33 = vmax.f32 %v786_v44, 0.0  ;;  %v1472_v50 = vsel %vm145_vm0, %v1470_v37, %v1466_v38  ;;  %v1041_v42 = vpack.c.bf16 %v1039_v39, %v1039_v39  ;;  %v3829_v44 = vld [vmem:[#allocation7 + $0x200] ss:$8 sps:$4 sm:$0xff]   ;;  %v3832_v51 = vld [vmem:[#allocation7 + $0x210] ss:$8 sps:$4 sm:$0xff]  }
 0x33a   :  { %v792_v56 = vpack.c.bf16 %v790_v49, %v790_v49  ;;  %v1474_v32 = vpack.c.bf16 %v1472_v50, %v1472_v50  ;;  %v3835_v49 = vld [vmem:[#allocation7 + $0x220] ss:$8 sps:$4 sm:$0xff]   ;;  %v3840_v52 = vld [vmem:[#allocation7 + $0x234] ss:$8 sps:$4 sm:$0xff]  }
 0x33b   :  { %v793_v55 = vpack.c.bf16 %v791_v33, %v791_v33  ;;  %v3838_v33 = vld [vmem:[#allocation7 + $0x230] ss:$8 sps:$4 sm:$0xff]   ;;  %v3268_v39 = vld [vmem:[%s4602_s4 + $0x2] sm:$0x3] }
 0x33c   :  { %v1047_v50 = vrot.slane %v3268_v39, %v4474_v29 }
 0x33d   :  { %928 = vmatprep.mubr.bf16.mxu0 %v793_v55  ;;  %v3841_v55 = vld [vmem:[#allocation7 + $0x240] ss:$8 sps:$4 sm:$0xff]  }
 0x33e   :  { %929 = vmatmul.mubr.bf16.vlgmr.msra.gmra.mrb[0].mxu0 %v792_v56  ;;  %v3844_v56 = vld [vmem:[#allocation7 + $0x250] ss:$8 sps:$4 sm:$0xff]  }
 0x33f   :  { %1198 = vmatpush1.bf16.msra.mxu0 %v3781_v23  ;;  %3298 = vmatprep.mubr.msk.bf16.mxu0 %vm571_vm14, %v1042_v60  ;;  %v3846_v23 = vld [vmem:[#allocation7 + $0x254] ss:$8 sps:$4 sm:$0xff]   ;;  %v3847_v60 = vld [vmem:[#allocation7 + $0x260] ss:$8 sps:$4 sm:$0xff]  }
 0x340   :  { %1199 = vmatprep.subr.bf16.mxu0 %v3786_v58  ;;  %v3849_v58 = vld [vmem:[#allocation7 + $0x264] ss:$8 sps:$4 sm:$0xff]  }
 0x343   :  { %1200 = vmatpush1.bf16.msra.mxu0 %v3784_v61  ;;  %v3852_v61 = vld [vmem:[#allocation7 + $0x274] ss:$8 sps:$4 sm:$0xff]  }
 0x344   :  { %1201 = vmatprep.subr.bf16.mxu0 %v3789_v62  ;;  %v3859_v62 = vld [vmem:[#allocation8 + $0xc0] sm:$0xff]  }
 0x345   :  { %3519 = vmatprep.subr.bf16.mxu1 %v3859_v62  ;;  %v3885_v62 = vld [vmem:[#allocation8 + $0x168] sm:$0xff]  }
 0x347   :  { %1202 = vmatpush1.bf16.msra.mxu0 %v3787_v0  ;;  %v3860_v0 = vld [vmem:[#allocation8 + $0x80] sm:$0xff]  }
 0x348   :  { %1203 = vmatprep.subr.bf16.mxu0 %v3792_v1  ;;  %v3861_v1 = vld [vmem:[#allocation8 + $0xc8] sm:$0xff]   ;;  %3520 = vmatpush3.bf16.msra.mxu1 %v3860_v0 }
 0x349   :  { %3521 = vmatprep.subr.bf16.mxu1 %v3861_v1  ;;  %v3886_v0 = vld [vmem:[#allocation8 + $0x128] sm:$0xff]   ;;  %v3887_v1 = vld [vmem:[#allocation8 + $0x170] sm:$0xff]  }
 0x34b   :  { %1204 = vmatpush1.bf16.msra.mxu0 %v3790_v40  ;;  %v3850_v40 = vld [vmem:[#allocation7 + $0x270] ss:$8 sps:$4 sm:$0xff]  }
 0x34c   :  { %1205 = vmatprep.subr.bf16.mxu0 %v3795_v2  ;;  %v3855_v2 = vld [vmem:[#allocation7 + $0x284] ss:$8 sps:$4 sm:$0xff]  }
 0x34f   :  { %1206 = vmatpush1.bf16.msra.mxu0 %v3793_v59  ;;  %v3862_v59 = vld [vmem:[#allocation8 + $0x88] sm:$0xff]  }
 0x350   :  { %1207 = vmatprep.subr.bf16.mxu0 %v3798_v4  ;;  %v3863_v4 = vld [vmem:[#allocation8 + $0xd0] sm:$0xff]   ;;  %3522 = vmatpush3.bf16.msra.mxu1 %v3862_v59  ;;  %v3890_v59 = vld [vmem:[#allocation8 + $0x138] sm:$0xff]  }
 0x351   :  { %3523 = vmatprep.subr.bf16.mxu1 %v3863_v4  ;;  %v3893_v4 = vld [vmem:[#allocation7 + $0x2a4] ss:$8 sps:$4 sm:$0xff]  }
 0x353   :  { %1208 = vmatpush1.bf16.msra.mxu0 %v3796_v5  ;;  %v1460_v5 = vrot.slane %v4396_v27, 6 }
 0x354   :  { %1209 = vmatprep.subr.bf16.mxu0 %v3801_v6  ;;  %v3853_v6 = vld [vmem:[#allocation7 + $0x280] ss:$8 sps:$4 sm:$0xff]  }
 0x357   :  { %1210 = vmatpush1.bf16.msra.mxu0 %v3799_v7  ;;  %v3858_v7 = vld [vmem:[#allocation7 + $0x294] ss:$8 sps:$4 sm:$0xff]  }
 0x358   :  { %1211 = vmatprep.subr.bf16.mxu0 %v3804_v8  ;;  %v3864_v8 = vld [vmem:[#allocation8 + $0x90] sm:$0xff]  }
 0x359   :  { %3524 = vmatpush3.bf16.msra.mxu1 %v3864_v8 }
 0x35b   :  { %1212 = vmatpush1.bf16.msra.mxu0 %v3802_v9  ;;  %v1465_v9 = vrot.slane %v4396_v27, 4 }
 0x35c   :  { %1213 = vmatprep.subr.bf16.mxu0 %v3807_v12  ;;  %v3865_v12 = vld [vmem:[#allocation8 + $0xd8] sm:$0xff]  }
 0x35d   :  { %3525 = vmatprep.subr.bf16.mxu1 %v3865_v12 }
 0x35f   :  { %1214 = vmatpush1.bf16.msra.mxu0 %v3805_v14  ;;  %v1469_v14 = vsel %vm391_vm1, %v4396_v27, %v1460_v5  ;;  %v3871_v27 = vld [vmem:[#allocation8 + $0xf0] sm:$0xff]   ;;  %v3316_v5 = vld [vmem:[%s4602_s4 + $0x4] sm:$0x3] }
 0x360   :  { %1215 = vmatprep.subr.bf16.mxu0 %v3810_v15  ;;  %v3856_v15 = vld [vmem:[#allocation7 + $0x290] ss:$8 sps:$4 sm:$0xff]  }
 0x363   :  { %1216 = vmatpush1.bf16.msra.mxu0 %v3808_v16  ;;  %v3866_v16 = vld [vmem:[#allocation8 + $0x98] sm:$0xff]  }
 0x364   :  { %1217 = vmatprep.subr.bf16.mxu0 %v3813_v19  ;;  %v1471_v19 = vsel %vm145_vm0, %v1469_v14, %v1465_v9  ;;  %3526 = vmatpush3.bf16.msra.mxu1 %v3866_v16 }
 0x367   :  { %1218 = vmatpush1.bf16.msra.mxu0 %v3811_v20  ;;  %v3867_v20 = vld [vmem:[#allocation8 + $0xe0] sm:$0xff]  }
 0x368   :  { %1219 = vmatprep.subr.bf16.mxu0 %v3816_v22  ;;  %v1473_v22 = vpack.c.bf16 %v1471_v19, %v1471_v19  ;;  %3527 = vmatprep.subr.bf16.mxu1 %v3867_v20 }
 0x36b   :  { %1220 = vmatpush1.bf16.msra.mxu0 %v3814_v24  ;;  %v3868_v24 = vld [vmem:[#allocation8 + $0xa0] sm:$0xff]  }
 0x36c   :  { %1221 = vmatprep.subr.bf16.mxu0 %v3819_v26  ;;  %3528 = vmatpush3.bf16.msra.mxu1 %v3868_v24  ;;  %v3870_v26 = vld [vmem:[#allocation8 + $0xa8] sm:$0xff]  }
 0x36d   :  { %3529 = vmatprep.subr.bf16.mxu1 %v3869_v25  ;;  %v3891_v24 = vld [vmem:[#allocation7 + $0x2a0] ss:$8 sps:$4 sm:$0xff]  }
 0x36f   :  { %1222 = vmatpush1.bf16.msra.mxu0 %v3817_v17  ;;  %v3873_v17 = vld [vmem:[#allocation8 + $0xf8] sm:$0xff]  }
 0x370   :  { %1223 = vmatprep.subr.bf16.mxu0 %v3822_v30  ;;  %3530 = vmatpush3.bf16.msra.mxu1 %v3870_v26  ;;  %v3874_v30 = vld [vmem:[#allocation8 + $0xb8] sm:$0xff]  }
 0x371   :  { %3531 = vmatprep.subr.bf16.mxu1 %v3871_v27  ;;  %v3896_v26 = vld [vmem:[#allocation7 + $0x2b4] ss:$8 sps:$4 sm:$0xff]   ;;  %v1893_v27 = vpack.c.bf16 %v4369_v46, %v4369_v46  ;;  %v3906_v46 = vld [vmem:[#allocation7 + $0x2f0] ss:$8 sps:$4 sm:$0xff]  }
 0x373   :  { %1224 = vmatpush1.bf16.msra.mxu0 %v3820_v31 }
 0x374   :  { %1609 = vmatprep.subr.bf16.mxu0 %v3825_v48  ;;  %3532 = vmatpush3.bf16.msra.mxu1 %v3872_v28  ;;  %v3894_v28 = vld [vmem:[#allocation7 + $0x2b0] ss:$8 sps:$4 sm:$0xff]  }
 0x375   :  { %3533 = vmatprep.subr.bf16.mxu1 %v3873_v17  ;;  %v3899_v17 = vld [vmem:[#allocation7 + $0x2c4] ss:$8 sps:$4 sm:$0xff]  }
 0x376   :  { %1230 = vmatmul.mubr.bf16.vlgmr.msra.gmra.mrb[4].mxu0 %v1041_v42 }
 0x377   :  { %1610 = vmatpush1.bf16.msra.mxu0 %v3823_v41  ;;  %3342 = vmatprep.mubr.msk.bf16.mxu0 %vm569_vm13, %v1474_v32  ;;  %v1051_v41 = vrot.slane %v3268_v39, %v4480_v34  ;;  %v3911_v39 = vld [vmem:[#allocation7 + $0x304] ss:$8 sps:$4 sm:$0xff]  }
 0x378   :  { %1611 = vmatprep.subr.bf16.mxu0 %v3828_v57  ;;  %3534 = vmatpush3.bf16.msra.mxu1 %v3874_v30  ;;  %v3897_v30 = vld [vmem:[#allocation7 + $0x2c0] ss:$8 sps:$4 sm:$0xff]  }
 0x379   :  { %3541 = vmatprep.subr.bf16.mxu1 %v3875_v35  ;;  %v3902_v35 = vld [vmem:[#allocation7 + $0x2d4] ss:$8 sps:$4 sm:$0xff]  }
 0x37b   :  { %1612 = vmatpush1.bf16.msra.mxu0 %v3826_v18 }
 0x37c   :  { %1613 = vmatprep.subr.bf16.mxu0 %v3831_v63 }
 0x37f   :  { %1614 = vmatpush1.bf16.msra.mxu0 %v3829_v44 }
 0x380   :  { %1615 = vmatprep.subr.bf16.mxu0 %v3834_v45 }
 0x383   :  { %1616 = vmatpush1.bf16.msra.mxu0 %v3832_v51 }
 0x384   :  { %1617 = vmatprep.subr.bf16.mxu0 %v3837_v47 }
 0x387   :  { %1618 = vmatpush1.bf16.msra.mxu0 %v3835_v49  ;;  %v3876_v49 = vld [vmem:[#allocation8 + $0x100] sm:$0xff]  }
 0x388   :  { %1619 = vmatprep.subr.bf16.mxu0 %v3840_v52 }
 0x38b   :  { %1620 = vmatpush1.bf16.msra.mxu0 %v3838_v33  ;;  %v3877_v33 = vld [vmem:[#allocation8 + $0x148] sm:$0xff]  }
 0x38c   :  { %1621 = vmatprep.subr.bf16.mxu0 %v3843_v53  ;;  %v3878_v53 = vld [vmem:[#allocation8 + $0x108] sm:$0xff]  }
 0x38f   :  { %1622 = vmatpush1.bf16.msra.mxu0 %v3841_v55  ;;  %v3879_v55 = vld [vmem:[#allocation8 + $0x150] sm:$0xff]  }
 0x390   :  { %1623 = vmatprep.subr.bf16.mxu0 %v3846_v23  ;;  %v3880_v23 = vld [vmem:[#allocation8 + $0x110] sm:$0xff]  }
 0x393   :  { %1624 = vmatpush1.bf16.msra.mxu0 %v3844_v56  ;;  %v3881_v56 = vld [vmem:[#allocation8 + $0x158] sm:$0xff]  }
 0x394   :  { %1625 = vmatprep.subr.bf16.mxu0 %v3849_v58  ;;  %v3882_v58 = vld [vmem:[#allocation8 + $0x118] sm:$0xff]  }
 0x397   :  { %1626 = vmatpush1.bf16.msra.mxu0 %v3847_v60  ;;  %v3883_v60 = vld [vmem:[#allocation8 + $0x160] sm:$0xff]  }
 0x398   :  { %1627 = vmatprep.subr.bf16.mxu0 %v3852_v61  ;;  %v3884_v61 = vld [vmem:[#allocation8 + $0x120] sm:$0xff]  }
 0x39b   :  { %1628 = vmatpush1.bf16.msra.mxu0 %v3850_v40  ;;  %v3888_v40 = vld [vmem:[#allocation8 + $0x130] sm:$0xff]  }
 0x39c   :  { %1629 = vmatprep.subr.bf16.mxu0 %v3855_v2  ;;  %v3889_v2 = vld [vmem:[#allocation8 + $0x178] sm:$0xff]  }
 0x39f   :  { %1630 = vmatpush1.bf16.msra.mxu0 %v3853_v6  ;;  %v1479_v6 = vrot.slane %v3316_v5, %v4474_v29 }
 0x3a0   :  { %1631 = vmatprep.subr.bf16.mxu0 %v3858_v7  ;;  %v1483_v7 = vrot.slane %v3316_v5, %v4480_v34  ;;  %v2273_v5 = vpack.c.bf16 %v4451_v10, %v4451_v10  ;;  %v3962_v10 = vld [vmem:[#allocation7 + $0x414] ss:$8 sps:$4 sm:$0xff]  }
 0x3a3   :  { %1632 = vmatpush1.bf16.msra.mxu0 %v3856_v15 }
 0x3a6   :  { %1642 = vmatmul.mubr.bf16.vlgmr.msra.gmra.mrb[8].mxu0 %v1473_v22 }
 0x411   :  { %v3513_v36 = vpop.f32.mrb[0].mxu0 }
 0x412   :  { %v3514_v37 = vpop.f32.mrb[1].mxu0 }
 0x413   :  { %v4508_v31 = vadd.f32 %v3514_v37, %v3513_v36  ;;  %v3516_v38 = vpop.f32.mrb[2].mxu0  ;;  %v3900_v36 = vld [vmem:[#allocation7 + $0x2d0] ss:$8 sps:$4 sm:$0xff]   ;;  %v3905_v37 = vld [vmem:[#allocation7 + $0x2e4] ss:$8 sps:$4 sm:$0xff]  }
 0x414   :  { %v3517_v48 = vpop.f32.mrb[3].mxu0  ;;  %v3903_v38 = vld [vmem:[#allocation7 + $0x2e0] ss:$8 sps:$4 sm:$0xff]  }
 0x415   :  { %v3908_v48 = vld [vmem:[#allocation7 + $0x2f4] ss:$8 sps:$4 sm:$0xff]  }
 0x449   :  { %v1231_v42 = vpop.f32.mrb[4].mxu0 }
 0x44a   :  { %v1232_v57 = vadd.f32 %v1231_v42, %v1047_v50  ;;  %v1233_v32 = vpop.f32.mrb[5].mxu0  ;;  %v3909_v50 = vld [vmem:[#allocation7 + $0x300] ss:$8 sps:$4 sm:$0xff]   ;;  %v3699_v42 = vunpack.i.l.bf16 %v4442_v3 }
 0x44b   :  { %v1234_v18 = vadd.f32 %v1233_v32, %v1051_v41  ;;  %v1235_v63 = vpop.f32.mrb[6].mxu0  ;;  %v3914_v41 = vld [vmem:[#allocation7 + $0x314] ss:$8 sps:$4 sm:$0xff]   ;;  %v3917_v32 = vld [vmem:[#allocation7 + $0x324] ss:$8 sps:$4 sm:$0xff]  }
 0x44c   :  { %v1238_v44 = vmax.f32 %v1232_v57, 0.0  ;;  %v1236_v45 = vpop.f32.mrb[7].mxu0  ;;  %v3912_v57 = vld [vmem:[#allocation7 + $0x310] ss:$8 sps:$4 sm:$0xff]  }
 0x44d   :  { %v1239_v51 = vmax.f32 %v1234_v18, 0.0  ;;  %v1877_v18 = vsel %vm569_vm13, %v4425_v54, %v4415_v43  ;;  %v3920_v45 = vld [vmem:[#allocation7 + $0x334] ss:$8 sps:$4 sm:$0xff]   ;;  %v3924_v43 = vld [vmem:[#allocation7 + $0x350] ss:$8 sps:$4 sm:$0xff]   ;;  %v4169_v54 = vmov 0  }
 0x44e   :  { %v1240_v52 = vpack.c.bf16 %v1238_v44, %v1238_v44  ;;  %v1878_v63 = vsel %vm571_vm14, %v1877_v18, %v3699_v42  ;;  %v3915_v44 = vld [vmem:[#allocation7 + $0x320] ss:$8 sps:$4 sm:$0xff]   ;;  %v3987_v18 = vld [vmem:[#allocation8 + $0x1f0] sm:$0xff]  }
 0x44f   :  { %v1241_v47 = vpack.c.bf16 %v1239_v51, %v1239_v51  ;;  %v1884_v51 = vrot.slane %v1878_v63, 4  ;;  %v3985_v42 = vld [vmem:[#allocation8 + $0x1e8] sm:$0xff]   ;;  %v3988_v63 = vld [vmem:[#allocation8 + $0x1b0] sm:$0xff]  }
 0x451   :  { %1376 = vmatprep.mubr.bf16.mxu1 %v1241_v47  ;;  %v3918_v47 = vld [vmem:[#allocation7 + $0x330] ss:$8 sps:$4 sm:$0xff]   ;;  %v1890_v3 = vsel %vm145_vm0, %v4458_v13, %v1884_v51  ;;  %v3935_v13 = vld [vmem:[#allocation7 + $0x384] ss:$8 sps:$4 sm:$0xff]  }
 0x452   :  { %1377 = vmatmul.mubr.bf16.vlgmr.msra.gmra.mrb[8].mxu1 %v1240_v52  ;;  %v3921_v52 = vld [vmem:[#allocation7 + $0x340] ss:$8 sps:$4 sm:$0xff]  }
 0x453   :  { %3542 = vmatpush3.bf16.msra.mxu1 %v3876_v49  ;;  %v3923_v49 = vld [vmem:[#allocation7 + $0x344] ss:$8 sps:$4 sm:$0xff]  }
 0x454   :  { %3543 = vmatprep.subr.bf16.mxu1 %v3877_v33  ;;  %v1892_v33 = vpack.c.bf16 %v1890_v3, %v1890_v3  ;;  %v3991_v51 = vld [vmem:[#allocation8 + $0x240] sm:$0xff]  }
 0x457   :  { %3544 = vmatpush3.bf16.msra.mxu1 %v3878_v53  ;;  %v3926_v53 = vld [vmem:[#allocation7 + $0x354] ss:$8 sps:$4 sm:$0xff]  }
 0x458   :  { %3545 = vmatprep.subr.bf16.mxu1 %v3879_v55  ;;  %v3929_v55 = vld [vmem:[#allocation7 + $0x364] ss:$8 sps:$4 sm:$0xff]  }
 0x45b   :  { %3546 = vmatpush3.bf16.msra.mxu1 %v3880_v23  ;;  %v3927_v23 = vld [vmem:[#allocation7 + $0x360] ss:$8 sps:$4 sm:$0xff]  }
 0x45c   :  { %3547 = vmatprep.subr.bf16.mxu1 %v3881_v56  ;;  %v3932_v56 = vld [vmem:[#allocation7 + $0x374] ss:$8 sps:$4 sm:$0xff]  }
 0x45f   :  { %3548 = vmatpush3.bf16.msra.mxu1 %v3882_v58  ;;  %v3930_v58 = vld [vmem:[#allocation7 + $0x370] ss:$8 sps:$4 sm:$0xff]  }
 0x460   :  { %3549 = vmatprep.subr.bf16.mxu1 %v3883_v60  ;;  %v3933_v60 = vld [vmem:[#allocation7 + $0x380] ss:$8 sps:$4 sm:$0xff]  }
 0x463   :  { %3550 = vmatpush3.bf16.msra.mxu1 %v3884_v61  ;;  %v3938_v61 = vld [vmem:[#allocation7 + $0x394] ss:$8 sps:$4 sm:$0xff]  }
 0x464   :  { %3551 = vmatprep.subr.bf16.mxu1 %v3885_v62  ;;  %v3936_v62 = vld [vmem:[#allocation7 + $0x390] ss:$8 sps:$4 sm:$0xff]  }
 0x467   :  { %3552 = vmatpush3.bf16.msra.mxu1 %v3886_v0  ;;  %v3941_v0 = vld [vmem:[#allocation7 + $0x3a4] ss:$8 sps:$4 sm:$0xff]  }
 0x468   :  { %3553 = vmatprep.subr.bf16.mxu1 %v3887_v1  ;;  %v3939_v1 = vld [vmem:[#allocation7 + $0x3a0] ss:$8 sps:$4 sm:$0xff]  }
 0x46b   :  { %3554 = vmatpush3.bf16.msra.mxu1 %v3888_v40  ;;  %v3944_v40 = vld [vmem:[#allocation7 + $0x3b4] ss:$8 sps:$4 sm:$0xff]  }
 0x46c   :  { %3555 = vmatprep.subr.bf16.mxu1 %v3889_v2  ;;  %v3942_v2 = vld [vmem:[#allocation7 + $0x3b0] ss:$8 sps:$4 sm:$0xff]  }
 0x46f   :  { %3556 = vmatpush3.bf16.msra.mxu1 %v3890_v59  ;;  %v3947_v59 = vld [vmem:[#allocation7 + $0x3c4] ss:$8 sps:$4 sm:$0xff]  }
 0x470   :  { %2008 = vmatprep.subr.bf16.mxu1 %v3893_v4  ;;  %v3945_v4 = vld [vmem:[#allocation7 + $0x3c0] ss:$8 sps:$4 sm:$0xff]  }
 0x479   :  { %v1643_v8 = vpop.f32.mrb[8].mxu0 }
 0x47a   :  { %v1644_v9 = vadd.f32 %v1643_v8, %v1479_v6  ;;  %v1645_v12 = vpop.f32.mrb[9].mxu0  ;;  %v3950_v6 = vld [vmem:[#allocation7 + $0x3d4] ss:$8 sps:$4 sm:$0xff]   ;;  %v3953_v8 = vld [vmem:[#allocation7 + $0x3e4] ss:$8 sps:$4 sm:$0xff]  }
 0x47b   :  { %v1646_v14 = vadd.f32 %v1645_v12, %v1483_v7  ;;  %v1647_v15 = vpop.f32.mrb[10].mxu0  ;;  %v3948_v7 = vld [vmem:[#allocation7 + $0x3d0] ss:$8 sps:$4 sm:$0xff]   ;;  %v3956_v12 = vld [vmem:[#allocation7 + $0x3f4] ss:$8 sps:$4 sm:$0xff]  }
 0x47c   :  { %v1650_v16 = vmax.f32 %v1644_v9, 0.0  ;;  %v1648_v19 = vpop.f32.mrb[11].mxu0  ;;  %v3951_v9 = vld [vmem:[#allocation7 + $0x3e0] ss:$8 sps:$4 sm:$0xff]   ;;  %v3959_v15 = vld [vmem:[#allocation7 + $0x404] ss:$8 sps:$4 sm:$0xff]  }
 0x47d   :  { %v1651_v20 = vmax.f32 %v1646_v14, 0.0  ;;  %v3954_v14 = vld [vmem:[#allocation7 + $0x3f0] ss:$8 sps:$4 sm:$0xff]  }
 0x47e   :  { %v1652_v25 = vpack.c.bf16 %v1650_v16, %v1650_v16  ;;  %v3957_v16 = vld [vmem:[#allocation7 + $0x400] ss:$8 sps:$4 sm:$0xff]   ;;  %v3960_v19 = vld [vmem:[#allocation7 + $0x410] ss:$8 sps:$4 sm:$0xff]  }
 0x47f   :  { %v1653_v22 = vpack.c.bf16 %v1651_v20, %v1651_v20  ;;  %v3965_v20 = vld [vmem:[#allocation7 + $0x424] ss:$8 sps:$4 sm:$0xff]  }
 0x481   :  { %1788 = vmatprep.mubr.bf16.mxu1 %v1653_v22  ;;  %v3975_v22 = vld [vmem:[#allocation8 + $0x1c0] sm:$0xff]  }
 0x482   :  { %1789 = vmatmul.mubr.bf16.vlgmr.msra.gmra.mrb[12].mxu1 %v1652_v25  ;;  %v3977_v25 = vld [vmem:[#allocation8 + $0x1c8] sm:$0xff]   ;;  %3563 = vmatprep.subr.bf16.mxu0 %v3975_v22 }
 0x483   :  { %2009 = vmatpush1.bf16.msra.mxu1 %v3891_v24  ;;  %3382 = vmatprep.mubr.msk.bf16.mxu1 %vm567_vm12, %v1893_v27  ;;  %v3976_v24 = vld [vmem:[#allocation8 + $0x180] sm:$0xff]   ;;  %v2622_v27 = vpack.c.bf16 %v4454_v11, %v4454_v11 }
 0x484   :  { %2010 = vmatprep.subr.bf16.mxu1 %v3896_v26  ;;  %v3963_v26 = vld [vmem:[#allocation7 + $0x420] ss:$8 sps:$4 sm:$0xff]   ;;  %3564 = vmatpush3.bf16.msra.mxu0 %v3976_v24 }
 0x485   :  { %3565 = vmatprep.subr.bf16.mxu0 %v3977_v25  ;;  %v3969_v11 = vld [vmem:[#allocation7 + $0x440] ss:$8 sps:$4 sm:$0xff]  }
 0x486   :  { %v3992_v25 = vld [vmem:[#allocation8 + $0x200] sm:$0xff]  }
 0x487   :  { %2011 = vmatpush1.bf16.msra.mxu1 %v3894_v28  ;;  %v3968_v28 = vld [vmem:[#allocation7 + $0x434] ss:$8 sps:$4 sm:$0xff]  }
 0x488   :  { %2012 = vmatprep.subr.bf16.mxu1 %v3899_v17  ;;  %v3978_v17 = vld [vmem:[#allocation8 + $0x188] sm:$0xff]  }
 0x489   :  { %3566 = vmatpush3.bf16.msra.mxu0 %v3978_v17  ;;  %v3995_v17 = vld [vmem:[#allocation8 + $0x250] sm:$0xff]  }
 0x48b   :  { %2013 = vmatpush1.bf16.msra.mxu1 %v3897_v30  ;;  %v3979_v30 = vld [vmem:[#allocation8 + $0x1d0] sm:$0xff]  }
 0x48c   :  { %2014 = vmatprep.subr.bf16.mxu1 %v3902_v35  ;;  %v3966_v35 = vld [vmem:[#allocation7 + $0x430] ss:$8 sps:$4 sm:$0xff]   ;;  %3567 = vmatprep.subr.bf16.mxu0 %v3979_v30 }
 0x48d   :  { %v3996_v30 = vld [vmem:[#allocation8 + $0x210] sm:$0xff]  }
 0x48f   :  { %2015 = vmatpush1.bf16.msra.mxu1 %v3900_v36  ;;  %v3971_v36 = vld [vmem:[#allocation7 + $0x444] ss:$8 sps:$4 sm:$0xff]  }
 0x490   :  { %2016 = vmatprep.subr.bf16.mxu1 %v3905_v37  ;;  %v3980_v37 = vld [vmem:[#allocation8 + $0x190] sm:$0xff]  }
 0x491   :  { %3568 = vmatpush3.bf16.msra.mxu0 %v3980_v37  ;;  %v3999_v37 = vld [vmem:[#allocation8 + $0x260] sm:$0xff]  }
 0x493   :  { %2017 = vmatpush1.bf16.msra.mxu1 %v3903_v38  ;;  %v3981_v38 = vld [vmem:[#allocation8 + $0x1d8] sm:$0xff]  }
 0x494   :  { %2018 = vmatprep.subr.bf16.mxu1 %v3908_v48  ;;  %v3974_v48 = vld [vmem:[#allocation7 + $0x454] ss:$8 sps:$4 sm:$0xff]   ;;  %3569 = vmatprep.subr.bf16.mxu0 %v3981_v38  ;;  %v4000_v38 = vld [vmem:[#allocation8 + $0x220] sm:$0xff]  }
 0x497   :  { %2019 = vmatpush1.bf16.msra.mxu1 %v3906_v46  ;;  %v3982_v46 = vld [vmem:[#allocation8 + $0x198] sm:$0xff]  }
 0x498   :  { %2020 = vmatprep.subr.bf16.mxu1 %v3911_v39  ;;  %v3983_v39 = vld [vmem:[#allocation8 + $0x1e0] sm:$0xff]   ;;  %3570 = vmatpush3.bf16.msra.mxu0 %v3982_v46 }
 0x499   :  { %3571 = vmatprep.subr.bf16.mxu0 %v3983_v39  ;;  %v3400_v46 = vld [vmem:[%s4602_s4 + $0x8] sm:$0x3]  ;;  %v4003_v39 = vld [vmem:[#allocation8 + $0x270] sm:$0xff]  }
 0x49b   :  { %2021 = vmatpush1.bf16.msra.mxu1 %v3909_v50  ;;  %v3972_v50 = vld [vmem:[#allocation7 + $0x450] ss:$8 sps:$4 sm:$0xff]  }
 0x49c   :  { %2022 = vmatprep.subr.bf16.mxu1 %v3914_v41  ;;  %v3984_v41 = vld [vmem:[#allocation8 + $0x1a0] sm:$0xff]  }
 0x49d   :  { %3572 = vmatpush3.bf16.msra.mxu0 %v3984_v41  ;;  %v2282_v41 = vrot.slane %v3400_v46, %v4480_v34 }
 0x49e   :  { %3573 = vmatprep.subr.bf16.mxu0 %v3985_v42  ;;  %v4004_v42 = vld [vmem:[#allocation8 + $0x230] sm:$0xff]  }
 0x49f   :  { %2023 = vmatpush1.bf16.msra.mxu1 %v3912_v57  ;;  %v2949_v57 = vpack.c.bf16 %v4466_v21, %v4466_v21  ;;  %v3251_v21 = vld [vmem:[%s4604_s6] ss:$0 sm:$0xff] }
 0x4a0   :  { %2024 = vmatprep.subr.bf16.mxu1 %v3917_v32  ;;  %v3986_v32 = vld [vmem:[#allocation8 + $0x1a8] sm:$0xff]  }
 0x4a1   :  { %3574 = vmatpush3.bf16.msra.mxu0 %v3986_v32 }
 0x4a2   :  { %3575 = vmatprep.subr.bf16.mxu0 %v3987_v18 }
 0x4a3   :  { %2025 = vmatpush1.bf16.msra.mxu1 %v3915_v44  ;;  %v3989_v44 = vld [vmem:[#allocation8 + $0x1f8] sm:$0xff]  }
 0x4a4   :  { %2026 = vmatprep.subr.bf16.mxu1 %v3920_v45  ;;  %v3990_v45 = vld [vmem:[#allocation8 + $0x1b8] sm:$0xff]  }
 0x4a5   :  { %3576 = vmatpush3.bf16.msra.mxu0 %v3988_v63 }
 0x4a6   :  { %3577 = vmatprep.subr.bf16.mxu0 %v3989_v44 }
 0x4a7   :  { %2027 = vmatpush1.bf16.msra.mxu1 %v3918_v47 }
 0x4a8   :  { %2365 = vmatprep.subr.bf16.mxu1 %v3923_v49  ;;  %v3299_v49 = vld [vmem:[%s4604_s6 + $0x1] ss:$0 sm:$0xff] }
 0x4a9   :  { %3578 = vmatpush3.bf16.msra.mxu0 %v3990_v45 }
 0x4aa   :  { %2041 = vmatmul.mubr.bf16.vlgmr.msra.gmra.mrb[16].mxu1 %v1892_v33  ;;  %3585 = vmatprep.subr.bf16.mxu0 %v3991_v51  ;;  %v4006_v51 = vld [vmem:[#allocation8 + $0x238] sm:$0xff]  }
 0x4ab   :  { %2366 = vmatpush1.bf16.msra.mxu1 %v3921_v52  ;;  %2397 = vmatprep.mubr.bf16.mxu1 %v4169_v54 }
 0x4ac   :  { %2367 = vmatprep.subr.bf16.mxu1 %v3926_v53 }
 0x4af   :  { %2368 = vmatpush1.bf16.msra.mxu1 %v3924_v43  ;;  %v931_v43 = vadd.f32 %v4508_v31, %v3251_v21 }
 0x4b0   :  { %2369 = vmatprep.subr.bf16.mxu1 %v3929_v55 }
 0x4b3   :  { %2370 = vmatpush1.bf16.msra.mxu1 %v3927_v23 }
 0x4b4   :  { %2371 = vmatprep.subr.bf16.mxu1 %v3932_v56 }
 0x4b7   :  { %2372 = vmatpush1.bf16.msra.mxu1 %v3930_v58 }
 0x4b8   :  { %2373 = vmatprep.subr.bf16.mxu1 %v3935_v13 }
 0x4bb   :  { %2374 = vmatpush1.bf16.msra.mxu1 %v3933_v60 }
 0x4bc   :  { %2375 = vmatprep.subr.bf16.mxu1 %v3938_v61  ;;  %v3343_v61 = vld [vmem:[%s4604_s6 + $0x2] ss:$0 sm:$0xff] }
 0x4bf   :  { %2376 = vmatpush1.bf16.msra.mxu1 %v3936_v62 }
 0x4c0   :  { %2377 = vmatprep.subr.bf16.mxu1 %v3941_v0 }
 0x4c3   :  { %2378 = vmatpush1.bf16.msra.mxu1 %v3939_v1 }
 0x4c4   :  { %2379 = vmatprep.subr.bf16.mxu1 %v3944_v40 }
 0x4c7   :  { %2380 = vmatpush1.bf16.msra.mxu1 %v3942_v2 }
 0x4c8   :  { %2697 = vmatprep.subr.bf16.mxu1 %v3947_v59 }
 0x4ca   :  { %2398 = vmatmul.mubr.bf16.vlgmr.msra.gmra.mrb[20].mxu1 %v2273_v5 }
 0x4cb   :  { %2698 = vmatpush1.bf16.msra.mxu1 %v3945_v4  ;;  %2729 = vmatprep.mubr.bf16.mxu1 %v4169_v54 }
 0x4cc   :  { %2699 = vmatprep.subr.bf16.mxu1 %v3950_v6 }
 0x4cf   :  { %2700 = vmatpush1.bf16.msra.mxu1 %v3948_v7  ;;  %v3360_v7 = vld [vmem:[%s4602_s4 + $0x6] sm:$0x3] }
 0x4d0   :  { %2701 = vmatprep.subr.bf16.mxu1 %v3953_v8  ;;  %v1898_v8 = vrot.slane %v3360_v7, %v4474_v29 }
 0x4d3   :  { %2702 = vmatpush1.bf16.msra.mxu1 %v3951_v9  ;;  %v1902_v9 = vrot.slane %v3360_v7, %v4480_v34  ;;  %v4019_v7 = vld [vmem:[#allocation8 + $0x2f0] sm:$0xff]  }
 0x4d4   :  { %2703 = vmatprep.subr.bf16.mxu1 %v3956_v12 }
 0x4d7   :  { %2704 = vmatpush1.bf16.msra.mxu1 %v3954_v14 }
 0x4d8   :  { %2705 = vmatprep.subr.bf16.mxu1 %v3959_v15 }
 0x4db   :  { %2706 = vmatpush1.bf16.msra.mxu1 %v3957_v16 }
 0x4dc   :  { %2707 = vmatprep.subr.bf16.mxu1 %v3962_v10 }
 0x4df   :  { %2708 = vmatpush1.bf16.msra.mxu1 %v3960_v19 }
 0x4e0   :  { %3004 = vmatprep.subr.bf16.mxu1 %v3965_v20 }
 0x4e2   :  { %3449 = vmatmul.mubr.msk.bf16.vlgmr.msra.gmra.mrb[24].mxu1 %vm571_vm14, %v2622_v27  ;;  %v3993_v27 = vld [vmem:[#allocation8 + $0x248] sm:$0xff]  }
 0x4e3   :  { %3005 = vmatpush1.bf16.msra.mxu1 %v3963_v26  ;;  %3036 = vmatprep.mubr.bf16.mxu1 %v4169_v54 }
 0x4e4   :  { %3006 = vmatprep.subr.bf16.mxu1 %v3968_v28  ;;  %v3994_v28 = vld [vmem:[#allocation8 + $0x208] sm:$0xff]  }
 0x4e7   :  { %3007 = vmatpush1.bf16.msra.mxu1 %v3966_v35  ;;  %v3997_v35 = vld [vmem:[#allocation8 + $0x258] sm:$0xff]  }
 0x4e8   :  { %3008 = vmatprep.subr.bf16.mxu1 %v3971_v36  ;;  %v3998_v36 = vld [vmem:[#allocation8 + $0x218] sm:$0xff]  }
 0x4eb   :  { %3009 = vmatpush1.bf16.msra.mxu1 %v3969_v11  ;;  %v4001_v11 = vld [vmem:[#allocation8 + $0x268] sm:$0xff]  }
 0x4ec   :  { %3010 = vmatprep.subr.bf16.mxu1 %v3974_v48  ;;  %v4002_v48 = vld [vmem:[#allocation8 + $0x228] sm:$0xff]  }
 0x4ef   :  { %3011 = vmatpush1.bf16.msra.mxu1 %v3972_v50  ;;  %v2278_v50 = vrot.slane %v3400_v46, %v4474_v29  ;;  %v4030_v46 = vld [vmem:[#allocation8 + $0x318] sm:$0xff]  }
 0x4f2   :  { %3477 = vmatmul.mubr.msk.bf16.vlgmr.msra.gmra.mrb[28].mxu1 %vm569_vm13, %v2949_v57  ;;  %v4005_v57 = vld [vmem:[#allocation8 + $0x278] sm:$0xff]  }
 0x525   :  { %v3535_v47 = vpop.f32.mrb[8].mxu1 }
 0x526   :  { %v3536_v3 = vpop.f32.mrb[9].mxu1 }
 0x527   :  { %v3537_v52 = vadd.f32 %v3536_v3, %v3535_v47  ;;  %v3538_v33 = vpop.f32.mrb[10].mxu1 }
 0x528   :  { %v3539_v53 = vpop.f32.mrb[11].mxu1  ;;  %v4008_v33 = vld [vmem:[#allocation8 + $0x280] sm:$0xff]  }
 0x529   :  { %v1379_v54 = vadd.f32 %v3537_v52, %v3299_v49  ;;  %v4007_v49 = vld [vmem:[#allocation8 + $0x2c0] sm:$0xff]  }
 0x52b   :  { %v1384_v55 = vadd.f32 %v1379_v54, %v931_v43  ;;  %v1386_v23 = vrot.slane %v1379_v54, 2  ;;  %v1389_v58 = vrot.slane %v1379_v54, 4  ;;  %v4009_v43 = vld [vmem:[#allocation8 + $0x2c8] sm:$0xff]  }
 0x52c   :  { %v4010_v54 = vld [vmem:[#allocation8 + $0x288] sm:$0xff]  }
 0x52d   :  { %v1388_v56 = vadd.f32 %v1386_v23, %v1384_v55  ;;  %v4011_v55 = vld [vmem:[#allocation8 + $0x2d0] sm:$0xff]  }
 0x52e   :  { %v4012_v23 = vld [vmem:[#allocation8 + $0x290] sm:$0xff]  }
 0x52f   :  { %v1391_v13 = vadd.f32 %v1389_v58, %v1388_v56  ;;  %v4013_v56 = vld [vmem:[#allocation8 + $0x2d8] sm:$0xff]  }
 0x530   :  { %v4014_v58 = vld [vmem:[#allocation8 + $0x298] sm:$0xff]  }
 0x555   :  { %v3557_v60 = vpop.f32.mrb[12].mxu1 }
 0x556   :  { %v3558_v62 = vpop.f32.mrb[13].mxu1 }
 0x557   :  { %v3559_v0 = vadd.f32 %v3558_v62, %v3557_v60  ;;  %v3560_v1 = vpop.f32.mrb[14].mxu1  ;;  %v4015_v60 = vld [vmem:[#allocation8 + $0x2e0] sm:$0xff]  }
 0x558   :  { %v3561_v40 = vpop.f32.mrb[15].mxu1  ;;  %v4016_v62 = vld [vmem:[#allocation8 + $0x2a0] sm:$0xff]  }
 0x559   :  { %v1791_v2 = vadd.f32 %v3559_v0, %v3343_v61  ;;  %v4017_v0 = vld [vmem:[#allocation8 + $0x2e8] sm:$0xff]  }
 0x55b   :  { %v1796_v59 = vadd.f32 %v1791_v2, %v1391_v13  ;;  %v1798_v4 = vrot.slane %v1791_v2, 2  ;;  %v1801_v31 = vrot.slane %v1791_v2, 4  ;;  %v3435_v13 = vld [vmem:[%s4602_s4 + $0xa] sm:$0x3] }
 0x55c   :  { %v2631_v61 = vrot.slane %v3435_v13, %v4480_v34 }
 0x55d   :  { %v1800_v5 = vadd.f32 %v1798_v4, %v1796_v59  ;;  %v4018_v4 = vld [vmem:[#allocation8 + $0x2a8] sm:$0xff]  }
 0x55f   :  { %v4551_v6 = vadd.f32 %v1801_v31, %v1800_v5  ;;  %v2627_v5 = vrot.slane %v3435_v13, %v4474_v29  ;;  %v3418_v13 = vld [vmem:[%s4604_s6 + $0x4] ss:$0 sm:$0xff] }
 0x57d   :  { %v2042_v12 = vpop.f32.mrb[16].mxu1 }
 0x57e   :  { %v2043_v14 = vadd.f32 %v2042_v12, %v1898_v8  ;;  %v2044_v15 = vpop.f32.mrb[17].mxu1  ;;  %v4020_v12 = vld [vmem:[#allocation8 + $0x2b0] sm:$0xff]  }
 0x57f   :  { %v2045_v16 = vadd.f32 %v2044_v15, %v1902_v9  ;;  %v2046_v10 = vpop.f32.mrb[18].mxu1  ;;  %v4021_v15 = vld [vmem:[#allocation8 + $0x2f8] sm:$0xff]  }
 0x580   :  { %v2049_v19 = vmax.f32 %v2043_v14, 0.0  ;;  %v2047_v20 = vpop.f32.mrb[19].mxu1 }
 0x581   :  { %v2050_v22 = vmax.f32 %v2045_v16, 0.0  ;;  %v4022_v16 = vld [vmem:[#allocation8 + $0x2b8] sm:$0xff]   ;;  %v4023_v20 = vld [vmem:[#allocation8 + $0x340] sm:$0xff]  }
 0x582   :  { %v2051_v26 = vpack.c.bf16 %v2049_v19, %v2049_v19  ;;  %v3467_v19 = vld [vmem:[%s4602_s4 + $0xc] sm:$0x3] }
 0x583   :  { %v2052_v24 = vpack.c.bf16 %v2050_v22, %v2050_v22  ;;  %v2958_v22 = vrot.slane %v3467_v19, %v4480_v34  ;;  %v4029_v34 = vld [vmem:[#allocation8 + $0x358] sm:$0xff]  }
 0x585   :  { %2187 = vmatprep.mubr.bf16.mxu0 %v2052_v24  ;;  %v4024_v24 = vld [vmem:[#allocation8 + $0x300] sm:$0xff]  }
 0x586   :  { %2188 = vmatmul.mubr.bf16.vlgmr.msra.gmra.mrb[12].mxu0 %v2051_v26  ;;  %v4025_v26 = vld [vmem:[#allocation8 + $0x348] sm:$0xff]  }
 0x587   :  { %3586 = vmatpush3.bf16.msra.mxu0 %v3992_v25 }
 0x588   :  { %3587 = vmatprep.subr.bf16.mxu0 %v3993_v27 }
 0x58b   :  { %3588 = vmatpush3.bf16.msra.mxu0 %v3994_v28 }
 0x58c   :  { %3589 = vmatprep.subr.bf16.mxu0 %v3995_v17 }
 0x58f   :  { %3590 = vmatpush3.bf16.msra.mxu0 %v3996_v30 }
 0x590   :  { %3591 = vmatprep.subr.bf16.mxu0 %v3997_v35  ;;  %v4026_v35 = vld [vmem:[#allocation8 + $0x308] sm:$0xff]  }
 0x593   :  { %3592 = vmatpush3.bf16.msra.mxu0 %v3998_v36 }
 0x594   :  { %3593 = vmatprep.subr.bf16.mxu0 %v3999_v37  ;;  %v4027_v37 = vld [vmem:[#allocation8 + $0x350] sm:$0xff]  }
 0x597   :  { %3594 = vmatpush3.bf16.msra.mxu0 %v4000_v38 }
 0x598   :  { %3595 = vmatprep.subr.bf16.mxu0 %v4001_v11 }
 0x59b   :  { %3596 = vmatpush3.bf16.msra.mxu0 %v4002_v48  ;;  %v4028_v48 = vld [vmem:[#allocation8 + $0x310] sm:$0xff]  }
 0x59c   :  { %3597 = vmatprep.subr.bf16.mxu0 %v4003_v39  ;;  %v4031_v39 = vld [vmem:[#allocation8 + $0x360] sm:$0xff]  }
 0x59d   :  { %v2399_v32 = vpop.f32.mrb[20].mxu1 }
 0x59e   :  { %v2400_v18 = vadd.f32 %v2399_v32, %v2278_v50  ;;  %v2401_v63 = vpop.f32.mrb[21].mxu1  ;;  %v4032_v50 = vld [vmem:[#allocation8 + $0x320] sm:$0xff]   ;;  %v4035_v32 = vld [vmem:[#allocation8 + $0x370] sm:$0xff]  }
 0x59f   :  { %v2402_v44 = vadd.f32 %v2401_v63, %v2282_v41  ;;  %3598 = vmatpush3.bf16.msra.mxu0 %v4004_v42  ;;  %v2403_v45 = vpop.f32.mrb[22].mxu1  ;;  %v4033_v41 = vld [vmem:[#allocation8 + $0x368] sm:$0xff]  }
 0x5a0   :  { %v2406_v47 = vmax.f32 %v2400_v18, 0.0  ;;  %v2404_v21 = vpop.f32.mrb[23].mxu1  ;;  %3599 = vmatprep.subr.bf16.mxu0 %v4005_v57  ;;  %v4034_v42 = vld [vmem:[#allocation8 + $0x328] sm:$0xff]   ;;  %v2954_v57 = vrot.slane %v3467_v19, %v4474_v29  ;;  %v4036_v18 = vld [vmem:[#allocation8 + $0x330] sm:$0xff]   ;;  %v4038_v45 = vld [vmem:[#allocation8 + $0x338] sm:$0xff]  }
 0x5a1   :  { %v2407_v3 = vmax.f32 %v2402_v44, 0.0  ;;  %v4037_v44 = vld [vmem:[#allocation8 + $0x378] sm:$0xff]  }
 0x5a2   :  { %v2408_v53 = vpack.c.bf16 %v2406_v47, %v2406_v47 }
 0x5a3   :  { %v2409_v52 = vpack.c.bf16 %v2407_v3, %v2407_v3  ;;  %3600 = vmatpush3.bf16.msra.mxu0 %v4006_v51 }
 0x5a4   :  { %3607 = vmatprep.subr.bf16.mxu0 %v4007_v49  ;;  %v3383_v49 = vld [vmem:[%s4604_s6 + $0x3] ss:$0 sm:$0xff] }
 0x5a5   :  { %2544 = vmatprep.mubr.bf16.mxu0 %v2409_v52 }
 0x5a6   :  { %2545 = vmatmul.mubr.bf16.vlgmr.msra.gmra.mrb[16].mxu0 %v2408_v53 }
 0x5a7   :  { %3608 = vmatpush3.bf16.msra.mxu0 %v4008_v33 }
 0x5a8   :  { %3609 = vmatprep.subr.bf16.mxu0 %v4009_v43 }
 0x5ab   :  { %3610 = vmatpush3.bf16.msra.mxu0 %v4010_v54 }
 0x5ac   :  { %3611 = vmatprep.subr.bf16.mxu0 %v4011_v55 }
 0x5af   :  { %3612 = vmatpush3.bf16.msra.mxu0 %v4012_v23 }
 0x5b0   :  { %3613 = vmatprep.subr.bf16.mxu0 %v4013_v56 }
 0x5b3   :  { %3614 = vmatpush3.bf16.msra.mxu0 %v4014_v58 }
 0x5b4   :  { %3615 = vmatprep.subr.bf16.mxu0 %v4015_v60 }
 0x5b5   :  { %v2731_v1 = vpop.f32.mrb[24].mxu1 }
 0x5b6   :  { %v2733_v40 = vpop.f32.mrb[25].mxu1  ;;  %v2732_v14 = vadd.f32 %v2731_v1, %v2627_v5 }
 0x5b7   :  { %v2734_v2 = vadd.f32 %v2733_v40, %v2631_v61  ;;  %3616 = vmatpush3.bf16.msra.mxu0 %v4016_v62  ;;  %v2735_v59 = vpop.f32.mrb[26].mxu1 }
 0x5b8   :  { %v2736_v31 = vpop.f32.mrb[27].mxu1  ;;  %3617 = vmatprep.subr.bf16.mxu0 %v4017_v0  ;;  %v2738_v10 = vmax.f32 %v2732_v14, 0.0 }
 0x5b9   :  { %v2739_v8 = vmax.f32 %v2734_v2, 0.0  ;;  %v3450_v31 = vld [vmem:[%s4604_s6 + $0x5] ss:$0 sm:$0xff] }
 0x5ba   :  { %v2740_v25 = vpack.c.bf16 %v2738_v10, %v2738_v10 }
 0x5bb   :  { %v2741_v9 = vpack.c.bf16 %v2739_v8, %v2739_v8  ;;  %3618 = vmatpush3.bf16.msra.mxu0 %v4018_v4 }
 0x5bc   :  { %3619 = vmatprep.subr.bf16.mxu0 %v4019_v7 }
 0x5bd   :  { %2876 = vmatprep.mubr.bf16.mxu0 %v2741_v9 }
 0x5bf   :  { %3620 = vmatpush3.bf16.msra.mxu0 %v4020_v12 }
 0x5c0   :  { %3621 = vmatprep.subr.bf16.mxu0 %v4021_v15 }
 0x5c3   :  { %3622 = vmatpush3.bf16.msra.mxu0 %v4022_v16 }
 0x5c4   :  { %3629 = vmatprep.subr.bf16.mxu0 %v4023_v20 }
 0x5c5   :  { %v3038_v27 = vpop.f32.mrb[28].mxu1 }
 0x5c6   :  { %2877 = vmatmul.mubr.bf16.vlgmr.msra.gmra.mrb[20].mxu0 %v2740_v25  ;;  %v3040_v28 = vpop.f32.mrb[29].mxu1  ;;  %v3039_v63 = vadd.f32 %v3038_v27, %v2954_v57 }
 0x5c7   :  { %v3041_v17 = vadd.f32 %v3040_v28, %v2958_v22  ;;  %3630 = vmatpush3.bf16.msra.mxu0 %v4024_v24  ;;  %v3042_v30 = vpop.f32.mrb[30].mxu1  ;;  %v3478_v24 = vld [vmem:[%s4604_s6 + $0x6] ss:$0 sm:$0xff] }
 0x5c8   :  { %v3043_v36 = vpop.f32.mrb[31].mxu1  ;;  %3631 = vmatprep.subr.bf16.mxu0 %v4025_v26  ;;  %v3045_v51 = vmax.f32 %v3039_v63, 0.0 }
 0x5c9   :  { %v3046_v38 = vmax.f32 %v3041_v17, 0.0 }
 0x5ca   :  { %v3047_v47 = vpack.c.bf16 %v3045_v51, %v3045_v51 }
 0x5cb   :  { %v3048_v11 = vpack.c.bf16 %v3046_v38, %v3046_v38  ;;  %3632 = vmatpush3.bf16.msra.mxu0 %v4026_v35 }
 0x5cc   :  { %3633 = vmatprep.subr.bf16.mxu0 %v4027_v37 }
 0x5cd   :  { %3183 = vmatprep.mubr.bf16.mxu0 %v3048_v11 }
 0x5cf   :  { %3634 = vmatpush3.bf16.msra.mxu0 %v4028_v48 }
 0x5d0   :  { %3635 = vmatprep.subr.bf16.mxu0 %v4029_v34 }
 0x5d3   :  { %3636 = vmatpush3.bf16.msra.mxu0 %v4030_v46 }
 0x5d4   :  { %3637 = vmatprep.subr.bf16.mxu0 %v4031_v39 }
 0x5d7   :  { %3638 = vmatpush3.bf16.msra.mxu0 %v4032_v50 }
 0x5d8   :  { %3639 = vmatprep.subr.bf16.mxu0 %v4033_v41 }
 0x5db   :  { %3640 = vmatpush3.bf16.msra.mxu0 %v4034_v42 }
 0x5dc   :  { %3641 = vmatprep.subr.bf16.mxu0 %v4035_v32 }
 0x5df   :  { %3642 = vmatpush3.bf16.msra.mxu0 %v4036_v18 }
 0x5e0   :  { %3643 = vmatprep.subr.bf16.mxu0 %v4037_v44 }
 0x5e3   :  { %3644 = vmatpush3.bf16.msra.mxu0 %v4038_v45 }
 0x5e6   :  { %3184 = vmatmul.mubr.bf16.vlgmr.msra.gmra.mrb[24].mxu0 %v3047_v47 }
 0x659   :  { %v3579_v21 = vpop.f32.mrb[12].mxu0 }
 0x65a   :  { %v3580_v29 = vpop.f32.mrb[13].mxu0 }
 0x65b   :  { %v3581_v3 = vadd.f32 %v3580_v29, %v3579_v21  ;;  %v3582_v52 = vpop.f32.mrb[14].mxu0 }
 0x65c   :  { %v3583_v33 = vpop.f32.mrb[15].mxu0 }
 0x65d   :  { %v2190_v53 = vadd.f32 %v3581_v3, %v3383_v49 }
 0x65f   :  { %v2195_v43 = vadd.f32 %v2190_v53, %v4551_v6  ;;  %v2197_v54 = vrot.slane %v2190_v53, 2  ;;  %v2200_v23 = vrot.slane %v2190_v53, 4 }
 0x661   :  { %v2199_v55 = vadd.f32 %v2197_v54, %v2195_v43 }
 0x663   :  { %v2202_v56 = vadd.f32 %v2200_v23, %v2199_v55 }
 0x679   :  { %v3601_v58 = vpop.f32.mrb[16].mxu0 }
 0x67a   :  { %v3602_v60 = vpop.f32.mrb[17].mxu0 }
 0x67b   :  { %v3603_v61 = vadd.f32 %v3602_v60, %v3601_v58  ;;  %v3604_v62 = vpop.f32.mrb[18].mxu0 }
 0x67c   :  { %v3605_v0 = vpop.f32.mrb[19].mxu0 }
 0x67d   :  { %v2547_v1 = vadd.f32 %v3603_v61, %v3418_v13 }
 0x67f   :  { %v2552_v40 = vadd.f32 %v2547_v1, %v2202_v56  ;;  %v2554_v2 = vrot.slane %v2547_v1, 2  ;;  %v2557_v4 = vrot.slane %v2547_v1, 4 }
 0x681   :  { %v2556_v59 = vadd.f32 %v2554_v2, %v2552_v40 }
 0x683   :  { %v2559_v5 = vadd.f32 %v2557_v4, %v2556_v59 }
 0x699   :  { %v3623_v6 = vpop.f32.mrb[20].mxu0 }
 0x69a   :  { %v3624_v7 = vpop.f32.mrb[21].mxu0 }
 0x69b   :  { %v3625_v8 = vadd.f32 %v3624_v7, %v3623_v6  ;;  %v3626_v9 = vpop.f32.mrb[22].mxu0 }
 0x69c   :  { %v3627_v12 = vpop.f32.mrb[23].mxu0 }
 0x69d   :  { %v2879_v14 = vadd.f32 %v3625_v8, %v3450_v31 }
 0x69f   :  { %v2884_v15 = vadd.f32 %v2879_v14, %v2559_v5  ;;  %v2886_v16 = vrot.slane %v2879_v14, 2  ;;  %v2889_v19 = vrot.slane %v2879_v14, 4 }
 0x6a1   :  { %v2888_v10 = vadd.f32 %v2886_v16, %v2884_v15 }
 0x6a3   :  { %v2891_v20 = vadd.f32 %v2889_v19, %v2888_v10 }
 0x6b9   :  { %v3645_v22 = vpop.f32.mrb[24].mxu0 }
 0x6ba   :  { %v3646_v25 = vpop.f32.mrb[25].mxu0 }
 0x6bb   :  { %v3647_v26 = vadd.f32 %v3646_v25, %v3645_v22  ;;  %v3648_v27 = vpop.f32.mrb[26].mxu0 }
 0x6bc   :  { %v3649_v28 = vpop.f32.mrb[27].mxu0 }
 0x6bd   :  { %v3186_v17 = vadd.f32 %v3647_v26, %v3478_v24 }
 0x6bf   :  { %v3191_v30 = vadd.f32 %v3186_v17, %v2891_v20  ;;  %v3193_v35 = vrot.slane %v3186_v17, 2  ;;  %v3196_v37 = vrot.slane %v3186_v17, 4 }
 0x6c1   :  { %v3195_v36 = vadd.f32 %v3193_v35, %v3191_v30 }
 0x6c3   :  { %v3198_v38 = vadd.f32 %v3196_v37, %v3195_v36 }
 0x6c5   :  { %3199 = vst [vmem:[#allocation10] sm:$0x3] %v3198_v38 }
 0x6c6   :  { %4138 = shalt.err (!%p4135_p8)
}
 0x6c7   :  { %s4139_s9 = scalar_lea.hbm %s4605_s7, 32 }
 0x6c8   :  { %p4140_p9 = scmp.ne.s32.totalorder %s4605_s7, %s4139_s9  ;;  %p4143_p10 = scmp.lt.u32.totalorder %s4139_s9, %s4605_s7 }
 0x6ca   :  { %p4145_p11 = pnand %p4143_p10, %p4140_p9 }
 0x6cc   :  { %4148 = shalt.err (!%p4145_p11)
}
 0x6cd   :  { %3209 = dma.vmem_to_hbm [thread:$0]  %s3207_s29, 32, %s4605_s7, [#allocation4]  }
 0x6ce   :  { %4155 = dma.done.wait [#allocation4], 32  }
 0x6cf   :  { %4156 = vsyncadd [#allocation4], 4294967264 }
 0x6d0   :  { %3213 = vsyncpa [#allocation3], 1 }
 0x6d1   :  { %3214 = vsyncpa [#allocation6], 1 }
 0x6d2   :  { %3215 = vsyncpa [#allocation9], 1 }
 0x6d3   :  { %3216 = vsyncpa [#allocation4], 1 }

</bundles_post_ra>
